<compile_context>
chip_gen: v7x
topology: tpu7x:2x2x1
jax: 0.10.0
libtpu: 0.0.40
codegen_flags: <defaults>
</compile_context>

<pallas_src>
import jax
import jax.numpy as jnp
from jax import lax
from jax.experimental import pallas as pl
from jax.experimental.pallas import tpu as pltpu


_BN_EPS = 1e-5


def _softplus(x):
    # PyTorch nn.Softplus(beta=1, threshold=20): identity for x > 20.
    return jnp.where(x > 20.0, x, jnp.log1p(jnp.exp(jnp.minimum(x, 20.0))))


def _sigmoid(x):
    return 1.0 / (1.0 + jnp.exp(-x))


def conv_layer_kernel(atom_ref, nbg_ref, bond_ref, ws_ref, wb_ref, out_ref):
    """
    atom_ref: (N, A)      f32  atom input features
    nbg_ref:  (M, N, 2A)  f32  neighbor-path projection, already gathered:
                               nbg[m, n, :] = (atom @ W_nbr^T)[nbr_fea_idx[n, m], :]
    bond_ref: (M, N, B)   mm   bond features, edge-slab layout
    ws_ref:   (A, 2A)     mm   W_self^T
    wb_ref:   (B, 2A)     mm   W_bond^T
    out_ref:  (N, A)      f32  atom output features

    mm = matmul operand dtype (f32 by default; bf16 optional for v6e/v7x MXU).
    All BN / gating math is done in f32 on the VPU/EUP regardless of mm.
    """
    N, A = atom_ref.shape
    M = nbg_ref.shape[0]
    two_a = ws_ref.shape[1]
    mm_dtype = ws_ref.dtype

    atom = atom_ref[...]                                    # f32, reused for residual
    # Self path: one matmul per atom, broadcast over the M slabs inside the kernel.
    s = jnp.dot(atom.astype(mm_dtype), ws_ref[...],
                preferred_element_type=jnp.float32)         # (N, 2A)
    wb = wb_ref[...]

    # ---- pass 1: per-slab pre-activations + BN1 accumulators (sum / sum-of-squares)
    g_slabs = []
    g_sum = jnp.zeros((1, two_a), jnp.float32)
    g_sqsum = jnp.zeros((1, two_a), jnp.float32)
    for m in range(M):                                      # static unroll, M is small
        bond_part = jnp.dot(bond_ref[m], wb,
                            preferred_element_type=jnp.float32)      # (N, 2A)
        g_m = s + nbg_ref[m] + bond_part                    # fc_full output (no bias)
        g_slabs.append(g_m)
        g_sum = g_sum + jnp.sum(g_m, axis=0, keepdims=True)
        g_sqsum = g_sqsum + jnp.sum(g_m * g_m, axis=0, keepdims=True)

    cnt1 = float(M * N)
    mean1 = g_sum / cnt1
    var1 = jnp.maximum(g_sqsum / cnt1 - mean1 * mean1, 0.0)  # biased variance
    inv_std1 = lax.rsqrt(var1 + _BN_EPS)

    # ---- pass 2: normalize, gate, neighbor-sum over M contiguous slabs ------------
    nbr_sumed = jnp.zeros((N, A), jnp.float32)
    for m in range(M):
        gn = (g_slabs[m] - mean1) * inv_std1
        nbr_filter = _sigmoid(gn[:, :A])
        nbr_core = _softplus(gn[:, A:])
        nbr_sumed = nbr_sumed + nbr_filter * nbr_core

    # ---- BN2 over the N atoms (training-mode batch stats, gamma=1, beta=0) --------
    mean2 = jnp.mean(nbr_sumed, axis=0, keepdims=True)
    var2 = jnp.mean((nbr_sumed - mean2) ** 2, axis=0, keepdims=True)
    sn = (nbr_sumed - mean2) * lax.rsqrt(var2 + _BN_EPS)

    # residual + softplus
    out_ref[...] = _softplus(atom + sn)


def prepare_params(fc_weight, atom_fea_len, matmul_dtype=jnp.float32):
    """Split / transpose fc_full.weight ONCE (not per forward call).

    fc_weight: (2A, 2A+B), PyTorch nn.Linear layout (out_features, in_features).
    Returns (ws_t, wn_t, wb_t) = W_self^T (A,2A), W_nbr^T (A,2A), W_bond^T (B,2A).
    fc_full.bias is intentionally dropped: bn1 (batch stats, gamma=1, beta=0)
    subtracts the per-column mean, which exactly cancels any constant column bias.
    """
    A = atom_fea_len
    ws_t = jnp.asarray(fc_weight[:, :A].T, dtype=matmul_dtype)
    wn_t = jnp.asarray(fc_weight[:, A:2 * A].T, dtype=jnp.float32)
    wb_t = jnp.asarray(fc_weight[:, 2 * A:].T, dtype=matmul_dtype)
    return ws_t, wn_t, wb_t


def conv_layer(atom_in_fea, nbr_fea, nbr_fea_idx, ws_t, wn_t, wb_t):
    """
    atom_in_fea: (N, A) f32
    nbr_fea:     (N, M, B) f32
    nbr_fea_idx: (N, M) int32
    ws_t/wn_t/wb_t: prepared weights from prepare_params().
    """
    N, A = atom_in_fea.shape
    _, M, B = nbr_fea.shape
    mm_dtype = ws_t.dtype

    # Neighbor path: project once per atom (N rows, not N*M), THEN gather the
    # projected rows — this is the ~3.3x per-edge MAC cut from the decomposition.
    nbr_proj = jnp.dot(atom_in_fea, wn_t)                          # (N, 2A) f32
    nbr_gathered = nbr_proj[nbr_fea_idx, :]                        # (N, M, 2A)
    # Edge-slab layout (M, N, feat): neighbor sum == M contiguous slab adds.
    nbr_gathered = jnp.transpose(nbr_gathered, (1, 0, 2))          # (M, N, 2A)
    bond_edges = jnp.transpose(nbr_fea, (1, 0, 2)).astype(mm_dtype)  # (M, N, B)

    vmem = pl.BlockSpec(memory_space=pltpu.MemorySpace.VMEM)
    out = pl.pallas_call(
        conv_layer_kernel,
        out_shape=jax.ShapeDtypeStruct((N, A), jnp.float32),
        in_specs=[vmem, vmem, vmem, vmem, vmem],
        out_specs=vmem,
        compiler_params=pltpu.CompilerParams(
            vmem_limit_bytes=32 * 1024 * 1024),
    )(atom_in_fea, nbr_gathered, bond_edges, ws_t, wb_t)
    return out


def _conv_layer_reference(atom_in_fea, nbr_fea, nbr_fea_idx, fc_weight, fc_bias):
    """Plain-JAX transcription of the PyTorch ConvLayer forward (training-mode BN)."""
    N, A = atom_in_fea.shape
    _, M, B = nbr_fea.shape
    atom_nbr_fea = atom_in_fea[nbr_fea_idx, :]
    self_fea = jnp.broadcast_to(atom_in_fea[:, None, :], (N, M, A))
    z = jnp.concatenate([self_fea, atom_nbr_fea, nbr_fea], axis=2)
    z = z.reshape(N * M, 2 * A + B)
    g = z @ fc_weight.T + fc_bias
    mean1 = jnp.mean(g, axis=0, keepdims=True)
    var1 = jnp.mean((g - mean1) ** 2, axis=0, keepdims=True)
    gn = (g - mean1) / jnp.sqrt(var1 + _BN_EPS)
    gn = gn.reshape(N, M, 2 * A)
    nbr_filter = _sigmoid(gn[..., :A])
    nbr_core = _softplus(gn[..., A:])
    nbr_sumed = jnp.sum(nbr_filter * nbr_core, axis=1)
    mean2 = jnp.mean(nbr_sumed, axis=0, keepdims=True)
    var2 = jnp.mean((nbr_sumed - mean2) ** 2, axis=0, keepdims=True)
    sn = (nbr_sumed - mean2) / jnp.sqrt(var2 + _BN_EPS)
    return _softplus(atom_in_fea + sn)


if __name__ == "__main__":
    # Small, deterministic problem sizes.
    N = 12             # total atoms in batch
    M = 8              # max neighbors
    atom_fea_len = 64  # A
    nbr_fea_len = 32   # B

    key = jax.random.PRNGKey(0)
    k1, k2, k3, k4, k5 = jax.random.split(key, 5)

    atom_in_fea = jax.random.normal(k1, (N, atom_fea_len), dtype=jnp.float32)
    nbr_fea = jax.random.normal(k2, (N, M, nbr_fea_len), dtype=jnp.float32)
    nbr_fea_idx = jax.random.randint(k3, (N, M), 0, N, dtype=jnp.int32)

    # nn.Linear(2A + B, 2A) deterministic init (uniform +-1/sqrt(fan_in)).
    fan_in = 2 * atom_fea_len + nbr_fea_len
    bound = 1.0 / (fan_in ** 0.5)
    fc_weight = jax.random.uniform(
        k4, (2 * atom_fea_len, fan_in), minval=-bound, maxval=bound,
        dtype=jnp.float32)
    fc_bias = jax.random.uniform(
        k5, (2 * atom_fea_len,), minval=-bound, maxval=bound,
        dtype=jnp.float32)

    # Parameter prep happens once, outside the per-call forward path.
    # (Use matmul_dtype=jnp.bfloat16 here for the v6e/v7x MXU fast path.)
    ws_t, wn_t, wb_t = prepare_params(fc_weight, atom_fea_len,
                                      matmul_dtype=jnp.float32)

    out = conv_layer(atom_in_fea, nbr_fea, nbr_fea_idx, ws_t, wn_t, wb_t)
    out = jax.block_until_ready(out)

    assert out.shape == (N, atom_fea_len)
    assert bool(jnp.all(jnp.isfinite(out)))

    # Semantics check vs the faithful concat + full-matmul + bias formulation
    # (the bias is mathematically cancelled by bn1, so results must agree).
    ref = _conv_layer_reference(atom_in_fea, nbr_fea, nbr_fea_idx, fc_weight, fc_bias)
    max_err = float(jnp.max(jnp.abs(out - ref)))
    assert jnp.allclose(out, ref, rtol=2e-3, atol=2e-3), max_err

    print("KERNEL_OK")
</pallas_src>

<mosaic_0001>
module attributes {stable_mosaic.version = 11 : i64} {
  func.func @conv_layer_kernel(%arg0: memref<12x64xf32, #tpu.memory_space<vmem>>, %arg1: memref<8x12x128xf32, #tpu.memory_space<vmem>>, %arg2: memref<8x12x32xf32, #tpu.memory_space<vmem>>, %arg3: memref<64x128xf32, #tpu.memory_space<vmem>>, %arg4: memref<32x128xf32, #tpu.memory_space<vmem>>, %arg5: memref<12x64xf32, #tpu.memory_space<vmem>>) attributes {dimension_semantics = [], scalar_prefetch = 0 : i64, scratch_operands = 0 : i64, tpu.core_type = #tpu.core_type<tc>} {
    %c0 = arith.constant 0 : index
    %c0_0 = arith.constant 0 : index
    %0 = vector.load %arg0[%c0, %c0_0] : memref<12x64xf32, #tpu.memory_space<vmem>>, vector<12x64xf32>
    %c0_1 = arith.constant 0 : index
    %c0_2 = arith.constant 0 : index
    %1 = vector.load %arg3[%c0_1, %c0_2] : memref<64x128xf32, #tpu.memory_space<vmem>>, vector<64x128xf32>
    %cst = arith.constant dense<0.000000e+00> : vector<12x128xf32>
    %2 = tpu.matmul %0, %1, %cst {dimension_numbers = #tpu.dot_dimension_numbers<[1], [0], [0], [1], [0, 0, 1, 1], [], []>} : vector<12x64xf32>, vector<64x128xf32>, vector<12x128xf32> -> vector<12x128xf32>
    %c0_3 = arith.constant 0 : index
    %c0_4 = arith.constant 0 : index
    %3 = vector.load %arg4[%c0_3, %c0_4] : memref<32x128xf32, #tpu.memory_space<vmem>>, vector<32x128xf32>
    %cst_5 = arith.constant 0.000000e+00 : f32
    %4 = vector.broadcast %cst_5 : f32 to vector<1x128xf32>
    %cst_6 = arith.constant 0.000000e+00 : f32
    %5 = vector.broadcast %cst_6 : f32 to vector<1x128xf32>
    %c0_7 = arith.constant 0 : index
    %c0_8 = arith.constant 0 : index
    %c0_9 = arith.constant 0 : index
    %6 = vector.load %arg2[%c0_7, %c0_8, %c0_9] : memref<8x12x32xf32, #tpu.memory_space<vmem>>, vector<1x12x32xf32>
    %7 = vector.shape_cast %6 : vector<1x12x32xf32> to vector<12x32xf32>
    %cst_10 = arith.constant dense<0.000000e+00> : vector<12x128xf32>
    %8 = tpu.matmul %7, %3, %cst_10 {dimension_numbers = #tpu.dot_dimension_numbers<[1], [0], [0], [1], [0, 0, 1, 1], [], []>} : vector<12x32xf32>, vector<32x128xf32>, vector<12x128xf32> -> vector<12x128xf32>
    %c0_11 = arith.constant 0 : index
    %c0_12 = arith.constant 0 : index
    %c0_13 = arith.constant 0 : index
    %9 = vector.load %arg1[%c0_11, %c0_12, %c0_13] : memref<8x12x128xf32, #tpu.memory_space<vmem>>, vector<1x12x128xf32>
    %10 = vector.shape_cast %9 : vector<1x12x128xf32> to vector<12x128xf32>
    %11 = arith.addf %2, %10 : vector<12x128xf32>
    %12 = arith.addf %11, %8 : vector<12x128xf32>
    %cst_14 = arith.constant dense<0.000000e+00> : vector<128xf32>
    %13 = vector.multi_reduction <add>, %12, %cst_14 [0] : vector<12x128xf32> to vector<128xf32>
    %14 = vector.shape_cast %13 : vector<128xf32> to vector<1x128xf32>
    %15 = arith.addf %4, %14 : vector<1x128xf32>
    %16 = arith.mulf %12, %12 : vector<12x128xf32>
    %cst_15 = arith.constant dense<0.000000e+00> : vector<128xf32>
    %17 = vector.multi_reduction <add>, %16, %cst_15 [0] : vector<12x128xf32> to vector<128xf32>
    %18 = vector.shape_cast %17 : vector<128xf32> to vector<1x128xf32>
    %19 = arith.addf %5, %18 : vector<1x128xf32>
    %c1 = arith.constant 1 : index
    %c0_16 = arith.constant 0 : index
    %c0_17 = arith.constant 0 : index
    %20 = vector.load %arg2[%c1, %c0_16, %c0_17] : memref<8x12x32xf32, #tpu.memory_space<vmem>>, vector<1x12x32xf32>
    %21 = vector.shape_cast %20 : vector<1x12x32xf32> to vector<12x32xf32>
    %cst_18 = arith.constant dense<0.000000e+00> : vector<12x128xf32>
    %22 = tpu.matmul %21, %3, %cst_18 {dimension_numbers = #tpu.dot_dimension_numbers<[1], [0], [0], [1], [0, 0, 1, 1], [], []>} : vector<12x32xf32>, vector<32x128xf32>, vector<12x128xf32> -> vector<12x128xf32>
    %c1_19 = arith.constant 1 : index
    %c0_20 = arith.constant 0 : index
    %c0_21 = arith.constant 0 : index
    %23 = vector.load %arg1[%c1_19, %c0_20, %c0_21] : memref<8x12x128xf32, #tpu.memory_space<vmem>>, vector<1x12x128xf32>
    %24 = vector.shape_cast %23 : vector<1x12x128xf32> to vector<12x128xf32>
    %25 = arith.addf %2, %24 : vector<12x128xf32>
    %26 = arith.addf %25, %22 : vector<12x128xf32>
    %cst_22 = arith.constant dense<0.000000e+00> : vector<128xf32>
    %27 = vector.multi_reduction <add>, %26, %cst_22 [0] : vector<12x128xf32> to vector<128xf32>
    %28 = vector.shape_cast %27 : vector<128xf32> to vector<1x128xf32>
    %29 = arith.addf %15, %28 : vector<1x128xf32>
    %30 = arith.mulf %26, %26 : vector<12x128xf32>
    %cst_23 = arith.constant dense<0.000000e+00> : vector<128xf32>
    %31 = vector.multi_reduction <add>, %30, %cst_23 [0] : vector<12x128xf32> to vector<128xf32>
    %32 = vector.shape_cast %31 : vector<128xf32> to vector<1x128xf32>
    %33 = arith.addf %19, %32 : vector<1x128xf32>
    %c2 = arith.constant 2 : index
    %c0_24 = arith.constant 0 : index
    %c0_25 = arith.constant 0 : index
    %34 = vector.load %arg2[%c2, %c0_24, %c0_25] : memref<8x12x32xf32, #tpu.memory_space<vmem>>, vector<1x12x32xf32>
    %35 = vector.shape_cast %34 : vector<1x12x32xf32> to vector<12x32xf32>
    %cst_26 = arith.constant dense<0.000000e+00> : vector<12x128xf32>
    %36 = tpu.matmul %35, %3, %cst_26 {dimension_numbers = #tpu.dot_dimension_numbers<[1], [0], [0], [1], [0, 0, 1, 1], [], []>} : vector<12x32xf32>, vector<32x128xf32>, vector<12x128xf32> -> vector<12x128xf32>
    %c2_27 = arith.constant 2 : index
    %c0_28 = arith.constant 0 : index
    %c0_29 = arith.constant 0 : index
    %37 = vector.load %arg1[%c2_27, %c0_28, %c0_29] : memref<8x12x128xf32, #tpu.memory_space<vmem>>, vector<1x12x128xf32>
    %38 = vector.shape_cast %37 : vector<1x12x128xf32> to vector<12x128xf32>
    %39 = arith.addf %2, %38 : vector<12x128xf32>
    %40 = arith.addf %39, %36 : vector<12x128xf32>
    %cst_30 = arith.constant dense<0.000000e+00> : vector<128xf32>
    %41 = vector.multi_reduction <add>, %40, %cst_30 [0] : vector<12x128xf32> to vector<128xf32>
    %42 = vector.shape_cast %41 : vector<128xf32> to vector<1x128xf32>
    %43 = arith.addf %29, %42 : vector<1x128xf32>
    %44 = arith.mulf %40, %40 : vector<12x128xf32>
    %cst_31 = arith.constant dense<0.000000e+00> : vector<128xf32>
    %45 = vector.multi_reduction <add>, %44, %cst_31 [0] : vector<12x128xf32> to vector<128xf32>
    %46 = vector.shape_cast %45 : vector<128xf32> to vector<1x128xf32>
    %47 = arith.addf %33, %46 : vector<1x128xf32>
    %c3 = arith.constant 3 : index
    %c0_32 = arith.constant 0 : index
    %c0_33 = arith.constant 0 : index
    %48 = vector.load %arg2[%c3, %c0_32, %c0_33] : memref<8x12x32xf32, #tpu.memory_space<vmem>>, vector<1x12x32xf32>
    %49 = vector.shape_cast %48 : vector<1x12x32xf32> to vector<12x32xf32>
    %cst_34 = arith.constant dense<0.000000e+00> : vector<12x128xf32>
    %50 = tpu.matmul %49, %3, %cst_34 {dimension_numbers = #tpu.dot_dimension_numbers<[1], [0], [0], [1], [0, 0, 1, 1], [], []>} : vector<12x32xf32>, vector<32x128xf32>, vector<12x128xf32> -> vector<12x128xf32>
    %c3_35 = arith.constant 3 : index
    %c0_36 = arith.constant 0 : index
    %c0_37 = arith.constant 0 : index
    %51 = vector.load %arg1[%c3_35, %c0_36, %c0_37] : memref<8x12x128xf32, #tpu.memory_space<vmem>>, vector<1x12x128xf32>
    %52 = vector.shape_cast %51 : vector<1x12x128xf32> to vector<12x128xf32>
    %53 = arith.addf %2, %52 : vector<12x128xf32>
    %54 = arith.addf %53, %50 : vector<12x128xf32>
    %cst_38 = arith.constant dense<0.000000e+00> : vector<128xf32>
    %55 = vector.multi_reduction <add>, %54, %cst_38 [0] : vector<12x128xf32> to vector<128xf32>
    %56 = vector.shape_cast %55 : vector<128xf32> to vector<1x128xf32>
    %57 = arith.addf %43, %56 : vector<1x128xf32>
    %58 = arith.mulf %54, %54 : vector<12x128xf32>
    %cst_39 = arith.constant dense<0.000000e+00> : vector<128xf32>
    %59 = vector.multi_reduction <add>, %58, %cst_39 [0] : vector<12x128xf32> to vector<128xf32>
    %60 = vector.shape_cast %59 : vector<128xf32> to vector<1x128xf32>
    %61 = arith.addf %47, %60 : vector<1x128xf32>
    %c4 = arith.constant 4 : index
    %c0_40 = arith.constant 0 : index
    %c0_41 = arith.constant 0 : index
    %62 = vector.load %arg2[%c4, %c0_40, %c0_41] : memref<8x12x32xf32, #tpu.memory_space<vmem>>, vector<1x12x32xf32>
    %63 = vector.shape_cast %62 : vector<1x12x32xf32> to vector<12x32xf32>
    %cst_42 = arith.constant dense<0.000000e+00> : vector<12x128xf32>
    %64 = tpu.matmul %63, %3, %cst_42 {dimension_numbers = #tpu.dot_dimension_numbers<[1], [0], [0], [1], [0, 0, 1, 1], [], []>} : vector<12x32xf32>, vector<32x128xf32>, vector<12x128xf32> -> vector<12x128xf32>
    %c4_43 = arith.constant 4 : index
    %c0_44 = arith.constant 0 : index
    %c0_45 = arith.constant 0 : index
    %65 = vector.load %arg1[%c4_43, %c0_44, %c0_45] : memref<8x12x128xf32, #tpu.memory_space<vmem>>, vector<1x12x128xf32>
    %66 = vector.shape_cast %65 : vector<1x12x128xf32> to vector<12x128xf32>
    %67 = arith.addf %2, %66 : vector<12x128xf32>
    %68 = arith.addf %67, %64 : vector<12x128xf32>
    %cst_46 = arith.constant dense<0.000000e+00> : vector<128xf32>
    %69 = vector.multi_reduction <add>, %68, %cst_46 [0] : vector<12x128xf32> to vector<128xf32>
    %70 = vector.shape_cast %69 : vector<128xf32> to vector<1x128xf32>
    %71 = arith.addf %57, %70 : vector<1x128xf32>
    %72 = arith.mulf %68, %68 : vector<12x128xf32>
    %cst_47 = arith.constant dense<0.000000e+00> : vector<128xf32>
    %73 = vector.multi_reduction <add>, %72, %cst_47 [0] : vector<12x128xf32> to vector<128xf32>
    %74 = vector.shape_cast %73 : vector<128xf32> to vector<1x128xf32>
    %75 = arith.addf %61, %74 : vector<1x128xf32>
    %c5 = arith.constant 5 : index
    %c0_48 = arith.constant 0 : index
    %c0_49 = arith.constant 0 : index
    %76 = vector.load %arg2[%c5, %c0_48, %c0_49] : memref<8x12x32xf32, #tpu.memory_space<vmem>>, vector<1x12x32xf32>
    %77 = vector.shape_cast %76 : vector<1x12x32xf32> to vector<12x32xf32>
    %cst_50 = arith.constant dense<0.000000e+00> : vector<12x128xf32>
    %78 = tpu.matmul %77, %3, %cst_50 {dimension_numbers = #tpu.dot_dimension_numbers<[1], [0], [0], [1], [0, 0, 1, 1], [], []>} : vector<12x32xf32>, vector<32x128xf32>, vector<12x128xf32> -> vector<12x128xf32>
    %c5_51 = arith.constant 5 : index
    %c0_52 = arith.constant 0 : index
    %c0_53 = arith.constant 0 : index
    %79 = vector.load %arg1[%c5_51, %c0_52, %c0_53] : memref<8x12x128xf32, #tpu.memory_space<vmem>>, vector<1x12x128xf32>
    %80 = vector.shape_cast %79 : vector<1x12x128xf32> to vector<12x128xf32>
    %81 = arith.addf %2, %80 : vector<12x128xf32>
    %82 = arith.addf %81, %78 : vector<12x128xf32>
    %cst_54 = arith.constant dense<0.000000e+00> : vector<128xf32>
    %83 = vector.multi_reduction <add>, %82, %cst_54 [0] : vector<12x128xf32> to vector<128xf32>
    %84 = vector.shape_cast %83 : vector<128xf32> to vector<1x128xf32>
    %85 = arith.addf %71, %84 : vector<1x128xf32>
    %86 = arith.mulf %82, %82 : vector<12x128xf32>
    %cst_55 = arith.constant dense<0.000000e+00> : vector<128xf32>
    %87 = vector.multi_reduction <add>, %86, %cst_55 [0] : vector<12x128xf32> to vector<128xf32>
    %88 = vector.shape_cast %87 : vector<128xf32> to vector<1x128xf32>
    %89 = arith.addf %75, %88 : vector<1x128xf32>
    %c6 = arith.constant 6 : index
    %c0_56 = arith.constant 0 : index
    %c0_57 = arith.constant 0 : index
    %90 = vector.load %arg2[%c6, %c0_56, %c0_57] : memref<8x12x32xf32, #tpu.memory_space<vmem>>, vector<1x12x32xf32>
    %91 = vector.shape_cast %90 : vector<1x12x32xf32> to vector<12x32xf32>
    %cst_58 = arith.constant dense<0.000000e+00> : vector<12x128xf32>
    %92 = tpu.matmul %91, %3, %cst_58 {dimension_numbers = #tpu.dot_dimension_numbers<[1], [0], [0], [1], [0, 0, 1, 1], [], []>} : vector<12x32xf32>, vector<32x128xf32>, vector<12x128xf32> -> vector<12x128xf32>
    %c6_59 = arith.constant 6 : index
    %c0_60 = arith.constant 0 : index
    %c0_61 = arith.constant 0 : index
    %93 = vector.load %arg1[%c6_59, %c0_60, %c0_61] : memref<8x12x128xf32, #tpu.memory_space<vmem>>, vector<1x12x128xf32>
    %94 = vector.shape_cast %93 : vector<1x12x128xf32> to vector<12x128xf32>
    %95 = arith.addf %2, %94 : vector<12x128xf32>
    %96 = arith.addf %95, %92 : vector<12x128xf32>
    %cst_62 = arith.constant dense<0.000000e+00> : vector<128xf32>
    %97 = vector.multi_reduction <add>, %96, %cst_62 [0] : vector<12x128xf32> to vector<128xf32>
    %98 = vector.shape_cast %97 : vector<128xf32> to vector<1x128xf32>
    %99 = arith.addf %85, %98 : vector<1x128xf32>
    %100 = arith.mulf %96, %96 : vector<12x128xf32>
    %cst_63 = arith.constant dense<0.000000e+00> : vector<128xf32>
    %101 = vector.multi_reduction <add>, %100, %cst_63 [0] : vector<12x128xf32> to vector<128xf32>
    %102 = vector.shape_cast %101 : vector<128xf32> to vector<1x128xf32>
    %103 = arith.addf %89, %102 : vector<1x128xf32>
    %c7 = arith.constant 7 : index
    %c0_64 = arith.constant 0 : index
    %c0_65 = arith.constant 0 : index
    %104 = vector.load %arg2[%c7, %c0_64, %c0_65] : memref<8x12x32xf32, #tpu.memory_space<vmem>>, vector<1x12x32xf32>
    %105 = vector.shape_cast %104 : vector<1x12x32xf32> to vector<12x32xf32>
    %cst_66 = arith.constant dense<0.000000e+00> : vector<12x128xf32>
    %106 = tpu.matmul %105, %3, %cst_66 {dimension_numbers = #tpu.dot_dimension_numbers<[1], [0], [0], [1], [0, 0, 1, 1], [], []>} : vector<12x32xf32>, vector<32x128xf32>, vector<12x128xf32> -> vector<12x128xf32>
    %c7_67 = arith.constant 7 : index
    %c0_68 = arith.constant 0 : index
    %c0_69 = arith.constant 0 : index
    %107 = vector.load %arg1[%c7_67, %c0_68, %c0_69] : memref<8x12x128xf32, #tpu.memory_space<vmem>>, vector<1x12x128xf32>
    %108 = vector.shape_cast %107 : vector<1x12x128xf32> to vector<12x128xf32>
    %109 = arith.addf %2, %108 : vector<12x128xf32>
    %110 = arith.addf %109, %106 : vector<12x128xf32>
    %cst_70 = arith.constant dense<0.000000e+00> : vector<128xf32>
    %111 = vector.multi_reduction <add>, %110, %cst_70 [0] : vector<12x128xf32> to vector<128xf32>
    %112 = vector.shape_cast %111 : vector<128xf32> to vector<1x128xf32>
    %113 = arith.addf %99, %112 : vector<1x128xf32>
    %114 = arith.mulf %110, %110 : vector<12x128xf32>
    %cst_71 = arith.constant dense<0.000000e+00> : vector<128xf32>
    %115 = vector.multi_reduction <add>, %114, %cst_71 [0] : vector<12x128xf32> to vector<128xf32>
    %116 = vector.shape_cast %115 : vector<128xf32> to vector<1x128xf32>
    %117 = arith.addf %103, %116 : vector<1x128xf32>
    %cst_72 = arith.constant 9.600000e+01 : f32
    %118 = vector.broadcast %cst_72 : f32 to vector<1x128xf32>
    %119 = arith.divf %113, %118 : vector<1x128xf32>
    %cst_73 = arith.constant 9.600000e+01 : f32
    %120 = vector.broadcast %cst_73 : f32 to vector<1x128xf32>
    %121 = arith.divf %117, %120 : vector<1x128xf32>
    %122 = arith.mulf %119, %119 : vector<1x128xf32>
    %123 = arith.subf %121, %122 : vector<1x128xf32>
    %cst_74 = arith.constant 0.000000e+00 : f32
    %124 = vector.broadcast %cst_74 : f32 to vector<1x128xf32>
    %125 = arith.maximumf %123, %124 : vector<1x128xf32>
    %cst_75 = arith.constant 9.99999974E-6 : f32
    %126 = vector.broadcast %cst_75 : f32 to vector<1x128xf32>
    %127 = arith.addf %125, %126 : vector<1x128xf32>
    %128 = math.rsqrt %127 : vector<1x128xf32>
    %cst_76 = arith.constant 0.000000e+00 : f32
    %129 = vector.broadcast %cst_76 : f32 to vector<12x64xf32>
    %130 = vector.broadcast %119 : vector<1x128xf32> to vector<12x128xf32>
    %131 = arith.subf %12, %130 : vector<12x128xf32>
    %132 = vector.broadcast %128 : vector<1x128xf32> to vector<12x128xf32>
    %133 = arith.mulf %131, %132 : vector<12x128xf32>
    %134 = vector.extract_strided_slice %133 {offsets = [0, 0], sizes = [12, 64], strides = [1, 1]} : vector<12x128xf32> to vector<12x64xf32>
    %cst_77 = arith.constant 0.000000e+00 : f32
    %135 = vector.broadcast %cst_77 : f32 to vector<12x64xf32>
    %136 = arith.subf %135, %134 : vector<12x64xf32>
    %137 = math.exp %136 : vector<12x64xf32>
    %cst_78 = arith.constant 1.000000e+00 : f32
    %138 = vector.broadcast %cst_78 : f32 to vector<12x64xf32>
    %139 = arith.addf %138, %137 : vector<12x64xf32>
    %cst_79 = arith.constant 1.000000e+00 : f32
    %140 = vector.broadcast %cst_79 : f32 to vector<12x64xf32>
    %141 = arith.divf %140, %139 : vector<12x64xf32>
    %142 = vector.extract_strided_slice %133 {offsets = [0, 64], sizes = [12, 64], strides = [1, 1]} : vector<12x128xf32> to vector<12x64xf32>
    %cst_80 = arith.constant 2.000000e+01 : f32
    %143 = vector.broadcast %cst_80 : f32 to vector<12x64xf32>
    %144 = arith.cmpf ogt, %142, %143 : vector<12x64xf32>
    %cst_81 = arith.constant 2.000000e+01 : f32
    %145 = vector.broadcast %cst_81 : f32 to vector<12x64xf32>
    %146 = arith.minimumf %142, %145 : vector<12x64xf32>
    %147 = math.exp %146 : vector<12x64xf32>
    %148 = math.log1p %147 : vector<12x64xf32>
    %149 = arith.select %144, %142, %148 : vector<12x64xi1>, vector<12x64xf32>
    %150 = arith.mulf %141, %149 : vector<12x64xf32>
    %151 = arith.addf %129, %150 : vector<12x64xf32>
    %152 = vector.broadcast %119 : vector<1x128xf32> to vector<12x128xf32>
    %153 = arith.subf %26, %152 : vector<12x128xf32>
    %154 = vector.broadcast %128 : vector<1x128xf32> to vector<12x128xf32>
    %155 = arith.mulf %153, %154 : vector<12x128xf32>
    %156 = vector.extract_strided_slice %155 {offsets = [0, 0], sizes = [12, 64], strides = [1, 1]} : vector<12x128xf32> to vector<12x64xf32>
    %cst_82 = arith.constant 0.000000e+00 : f32
    %157 = vector.broadcast %cst_82 : f32 to vector<12x64xf32>
    %158 = arith.subf %157, %156 : vector<12x64xf32>
    %159 = math.exp %158 : vector<12x64xf32>
    %cst_83 = arith.constant 1.000000e+00 : f32
    %160 = vector.broadcast %cst_83 : f32 to vector<12x64xf32>
    %161 = arith.addf %160, %159 : vector<12x64xf32>
    %cst_84 = arith.constant 1.000000e+00 : f32
    %162 = vector.broadcast %cst_84 : f32 to vector<12x64xf32>
    %163 = arith.divf %162, %161 : vector<12x64xf32>
    %164 = vector.extract_strided_slice %155 {offsets = [0, 64], sizes = [12, 64], strides = [1, 1]} : vector<12x128xf32> to vector<12x64xf32>
    %cst_85 = arith.constant 2.000000e+01 : f32
    %165 = vector.broadcast %cst_85 : f32 to vector<12x64xf32>
    %166 = arith.cmpf ogt, %164, %165 : vector<12x64xf32>
    %cst_86 = arith.constant 2.000000e+01 : f32
    %167 = vector.broadcast %cst_86 : f32 to vector<12x64xf32>
    %168 = arith.minimumf %164, %167 : vector<12x64xf32>
    %169 = math.exp %168 : vector<12x64xf32>
    %170 = math.log1p %169 : vector<12x64xf32>
    %171 = arith.select %166, %164, %170 : vector<12x64xi1>, vector<12x64xf32>
    %172 = arith.mulf %163, %171 : vector<12x64xf32>
    %173 = arith.addf %151, %172 : vector<12x64xf32>
    %174 = vector.broadcast %119 : vector<1x128xf32> to vector<12x128xf32>
    %175 = arith.subf %40, %174 : vector<12x128xf32>
    %176 = vector.broadcast %128 : vector<1x128xf32> to vector<12x128xf32>
    %177 = arith.mulf %175, %176 : vector<12x128xf32>
    %178 = vector.extract_strided_slice %177 {offsets = [0, 0], sizes = [12, 64], strides = [1, 1]} : vector<12x128xf32> to vector<12x64xf32>
    %cst_87 = arith.constant 0.000000e+00 : f32
    %179 = vector.broadcast %cst_87 : f32 to vector<12x64xf32>
    %180 = arith.subf %179, %178 : vector<12x64xf32>
    %181 = math.exp %180 : vector<12x64xf32>
    %cst_88 = arith.constant 1.000000e+00 : f32
    %182 = vector.broadcast %cst_88 : f32 to vector<12x64xf32>
    %183 = arith.addf %182, %181 : vector<12x64xf32>
    %cst_89 = arith.constant 1.000000e+00 : f32
    %184 = vector.broadcast %cst_89 : f32 to vector<12x64xf32>
    %185 = arith.divf %184, %183 : vector<12x64xf32>
    %186 = vector.extract_strided_slice %177 {offsets = [0, 64], sizes = [12, 64], strides = [1, 1]} : vector<12x128xf32> to vector<12x64xf32>
    %cst_90 = arith.constant 2.000000e+01 : f32
    %187 = vector.broadcast %cst_90 : f32 to vector<12x64xf32>
    %188 = arith.cmpf ogt, %186, %187 : vector<12x64xf32>
    %cst_91 = arith.constant 2.000000e+01 : f32
    %189 = vector.broadcast %cst_91 : f32 to vector<12x64xf32>
    %190 = arith.minimumf %186, %189 : vector<12x64xf32>
    %191 = math.exp %190 : vector<12x64xf32>
    %192 = math.log1p %191 : vector<12x64xf32>
    %193 = arith.select %188, %186, %192 : vector<12x64xi1>, vector<12x64xf32>
    %194 = arith.mulf %185, %193 : vector<12x64xf32>
    %195 = arith.addf %173, %194 : vector<12x64xf32>
    %196 = vector.broadcast %119 : vector<1x128xf32> to vector<12x128xf32>
    %197 = arith.subf %54, %196 : vector<12x128xf32>
    %198 = vector.broadcast %128 : vector<1x128xf32> to vector<12x128xf32>
    %199 = arith.mulf %197, %198 : vector<12x128xf32>
    %200 = vector.extract_strided_slice %199 {offsets = [0, 0], sizes = [12, 64], strides = [1, 1]} : vector<12x128xf32> to vector<12x64xf32>
    %cst_92 = arith.constant 0.000000e+00 : f32
    %201 = vector.broadcast %cst_92 : f32 to vector<12x64xf32>
    %202 = arith.subf %201, %200 : vector<12x64xf32>
    %203 = math.exp %202 : vector<12x64xf32>
    %cst_93 = arith.constant 1.000000e+00 : f32
    %204 = vector.broadcast %cst_93 : f32 to vector<12x64xf32>
    %205 = arith.addf %204, %203 : vector<12x64xf32>
    %cst_94 = arith.constant 1.000000e+00 : f32
    %206 = vector.broadcast %cst_94 : f32 to vector<12x64xf32>
    %207 = arith.divf %206, %205 : vector<12x64xf32>
    %208 = vector.extract_strided_slice %199 {offsets = [0, 64], sizes = [12, 64], strides = [1, 1]} : vector<12x128xf32> to vector<12x64xf32>
    %cst_95 = arith.constant 2.000000e+01 : f32
    %209 = vector.broadcast %cst_95 : f32 to vector<12x64xf32>
    %210 = arith.cmpf ogt, %208, %209 : vector<12x64xf32>
    %cst_96 = arith.constant 2.000000e+01 : f32
    %211 = vector.broadcast %cst_96 : f32 to vector<12x64xf32>
    %212 = arith.minimumf %208, %211 : vector<12x64xf32>
    %213 = math.exp %212 : vector<12x64xf32>
    %214 = math.log1p %213 : vector<12x64xf32>
    %215 = arith.select %210, %208, %214 : vector<12x64xi1>, vector<12x64xf32>
    %216 = arith.mulf %207, %215 : vector<12x64xf32>
    %217 = arith.addf %195, %216 : vector<12x64xf32>
    %218 = vector.broadcast %119 : vector<1x128xf32> to vector<12x128xf32>
    %219 = arith.subf %68, %218 : vector<12x128xf32>
    %220 = vector.broadcast %128 : vector<1x128xf32> to vector<12x128xf32>
    %221 = arith.mulf %219, %220 : vector<12x128xf32>
    %222 = vector.extract_strided_slice %221 {offsets = [0, 0], sizes = [12, 64], strides = [1, 1]} : vector<12x128xf32> to vector<12x64xf32>
    %cst_97 = arith.constant 0.000000e+00 : f32
    %223 = vector.broadcast %cst_97 : f32 to vector<12x64xf32>
    %224 = arith.subf %223, %222 : vector<12x64xf32>
    %225 = math.exp %224 : vector<12x64xf32>
    %cst_98 = arith.constant 1.000000e+00 : f32
    %226 = vector.broadcast %cst_98 : f32 to vector<12x64xf32>
    %227 = arith.addf %226, %225 : vector<12x64xf32>
    %cst_99 = arith.constant 1.000000e+00 : f32
    %228 = vector.broadcast %cst_99 : f32 to vector<12x64xf32>
    %229 = arith.divf %228, %227 : vector<12x64xf32>
    %230 = vector.extract_strided_slice %221 {offsets = [0, 64], sizes = [12, 64], strides = [1, 1]} : vector<12x128xf32> to vector<12x64xf32>
    %cst_100 = arith.constant 2.000000e+01 : f32
    %231 = vector.broadcast %cst_100 : f32 to vector<12x64xf32>
    %232 = arith.cmpf ogt, %230, %231 : vector<12x64xf32>
    %cst_101 = arith.constant 2.000000e+01 : f32
    %233 = vector.broadcast %cst_101 : f32 to vector<12x64xf32>
    %234 = arith.minimumf %230, %233 : vector<12x64xf32>
    %235 = math.exp %234 : vector<12x64xf32>
    %236 = math.log1p %235 : vector<12x64xf32>
    %237 = arith.select %232, %230, %236 : vector<12x64xi1>, vector<12x64xf32>
    %238 = arith.mulf %229, %237 : vector<12x64xf32>
    %239 = arith.addf %217, %238 : vector<12x64xf32>
    %240 = vector.broadcast %119 : vector<1x128xf32> to vector<12x128xf32>
    %241 = arith.subf %82, %240 : vector<12x128xf32>
    %242 = vector.broadcast %128 : vector<1x128xf32> to vector<12x128xf32>
    %243 = arith.mulf %241, %242 : vector<12x128xf32>
    %244 = vector.extract_strided_slice %243 {offsets = [0, 0], sizes = [12, 64], strides = [1, 1]} : vector<12x128xf32> to vector<12x64xf32>
    %cst_102 = arith.constant 0.000000e+00 : f32
    %245 = vector.broadcast %cst_102 : f32 to vector<12x64xf32>
    %246 = arith.subf %245, %244 : vector<12x64xf32>
    %247 = math.exp %246 : vector<12x64xf32>
    %cst_103 = arith.constant 1.000000e+00 : f32
    %248 = vector.broadcast %cst_103 : f32 to vector<12x64xf32>
    %249 = arith.addf %248, %247 : vector<12x64xf32>
    %cst_104 = arith.constant 1.000000e+00 : f32
    %250 = vector.broadcast %cst_104 : f32 to vector<12x64xf32>
    %251 = arith.divf %250, %249 : vector<12x64xf32>
    %252 = vector.extract_strided_slice %243 {offsets = [0, 64], sizes = [12, 64], strides = [1, 1]} : vector<12x128xf32> to vector<12x64xf32>
    %cst_105 = arith.constant 2.000000e+01 : f32
    %253 = vector.broadcast %cst_105 : f32 to vector<12x64xf32>
    %254 = arith.cmpf ogt, %252, %253 : vector<12x64xf32>
    %cst_106 = arith.constant 2.000000e+01 : f32
    %255 = vector.broadcast %cst_106 : f32 to vector<12x64xf32>
    %256 = arith.minimumf %252, %255 : vector<12x64xf32>
    %257 = math.exp %256 : vector<12x64xf32>
    %258 = math.log1p %257 : vector<12x64xf32>
    %259 = arith.select %254, %252, %258 : vector<12x64xi1>, vector<12x64xf32>
    %260 = arith.mulf %251, %259 : vector<12x64xf32>
    %261 = arith.addf %239, %260 : vector<12x64xf32>
    %262 = vector.broadcast %119 : vector<1x128xf32> to vector<12x128xf32>
    %263 = arith.subf %96, %262 : vector<12x128xf32>
    %264 = vector.broadcast %128 : vector<1x128xf32> to vector<12x128xf32>
    %265 = arith.mulf %263, %264 : vector<12x128xf32>
    %266 = vector.extract_strided_slice %265 {offsets = [0, 0], sizes = [12, 64], strides = [1, 1]} : vector<12x128xf32> to vector<12x64xf32>
    %cst_107 = arith.constant 0.000000e+00 : f32
    %267 = vector.broadcast %cst_107 : f32 to vector<12x64xf32>
    %268 = arith.subf %267, %266 : vector<12x64xf32>
    %269 = math.exp %268 : vector<12x64xf32>
    %cst_108 = arith.constant 1.000000e+00 : f32
    %270 = vector.broadcast %cst_108 : f32 to vector<12x64xf32>
    %271 = arith.addf %270, %269 : vector<12x64xf32>
    %cst_109 = arith.constant 1.000000e+00 : f32
    %272 = vector.broadcast %cst_109 : f32 to vector<12x64xf32>
    %273 = arith.divf %272, %271 : vector<12x64xf32>
    %274 = vector.extract_strided_slice %265 {offsets = [0, 64], sizes = [12, 64], strides = [1, 1]} : vector<12x128xf32> to vector<12x64xf32>
    %cst_110 = arith.constant 2.000000e+01 : f32
    %275 = vector.broadcast %cst_110 : f32 to vector<12x64xf32>
    %276 = arith.cmpf ogt, %274, %275 : vector<12x64xf32>
    %cst_111 = arith.constant 2.000000e+01 : f32
    %277 = vector.broadcast %cst_111 : f32 to vector<12x64xf32>
    %278 = arith.minimumf %274, %277 : vector<12x64xf32>
    %279 = math.exp %278 : vector<12x64xf32>
    %280 = math.log1p %279 : vector<12x64xf32>
    %281 = arith.select %276, %274, %280 : vector<12x64xi1>, vector<12x64xf32>
    %282 = arith.mulf %273, %281 : vector<12x64xf32>
    %283 = arith.addf %261, %282 : vector<12x64xf32>
    %284 = vector.broadcast %119 : vector<1x128xf32> to vector<12x128xf32>
    %285 = arith.subf %110, %284 : vector<12x128xf32>
    %286 = vector.broadcast %128 : vector<1x128xf32> to vector<12x128xf32>
    %287 = arith.mulf %285, %286 : vector<12x128xf32>
    %288 = vector.extract_strided_slice %287 {offsets = [0, 0], sizes = [12, 64], strides = [1, 1]} : vector<12x128xf32> to vector<12x64xf32>
    %cst_112 = arith.constant 0.000000e+00 : f32
    %289 = vector.broadcast %cst_112 : f32 to vector<12x64xf32>
    %290 = arith.subf %289, %288 : vector<12x64xf32>
    %291 = math.exp %290 : vector<12x64xf32>
    %cst_113 = arith.constant 1.000000e+00 : f32
    %292 = vector.broadcast %cst_113 : f32 to vector<12x64xf32>
    %293 = arith.addf %292, %291 : vector<12x64xf32>
    %cst_114 = arith.constant 1.000000e+00 : f32
    %294 = vector.broadcast %cst_114 : f32 to vector<12x64xf32>
    %295 = arith.divf %294, %293 : vector<12x64xf32>
    %296 = vector.extract_strided_slice %287 {offsets = [0, 64], sizes = [12, 64], strides = [1, 1]} : vector<12x128xf32> to vector<12x64xf32>
    %cst_115 = arith.constant 2.000000e+01 : f32
    %297 = vector.broadcast %cst_115 : f32 to vector<12x64xf32>
    %298 = arith.cmpf ogt, %296, %297 : vector<12x64xf32>
    %cst_116 = arith.constant 2.000000e+01 : f32
    %299 = vector.broadcast %cst_116 : f32 to vector<12x64xf32>
    %300 = arith.minimumf %296, %299 : vector<12x64xf32>
    %301 = math.exp %300 : vector<12x64xf32>
    %302 = math.log1p %301 : vector<12x64xf32>
    %303 = arith.select %298, %296, %302 : vector<12x64xi1>, vector<12x64xf32>
    %304 = arith.mulf %295, %303 : vector<12x64xf32>
    %305 = arith.addf %283, %304 : vector<12x64xf32>
    %cst_117 = arith.constant dense<0.000000e+00> : vector<64xf32>
    %306 = vector.multi_reduction <add>, %305, %cst_117 [0] : vector<12x64xf32> to vector<64xf32>
    %307 = vector.shape_cast %306 : vector<64xf32> to vector<1x64xf32>
    %cst_118 = arith.constant 1.200000e+01 : f32
    %308 = vector.broadcast %cst_118 : f32 to vector<1x64xf32>
    %309 = arith.divf %307, %308 : vector<1x64xf32>
    %310 = vector.broadcast %309 : vector<1x64xf32> to vector<12x64xf32>
    %311 = arith.subf %305, %310 : vector<12x64xf32>
    %312 = arith.mulf %311, %311 : vector<12x64xf32>
    %cst_119 = arith.constant dense<0.000000e+00> : vector<64xf32>
    %313 = vector.multi_reduction <add>, %312, %cst_119 [0] : vector<12x64xf32> to vector<64xf32>
    %314 = vector.shape_cast %313 : vector<64xf32> to vector<1x64xf32>
    %cst_120 = arith.constant 1.200000e+01 : f32
    %315 = vector.broadcast %cst_120 : f32 to vector<1x64xf32>
    %316 = arith.divf %314, %315 : vector<1x64xf32>
    %317 = vector.broadcast %309 : vector<1x64xf32> to vector<12x64xf32>
    %318 = arith.subf %305, %317 : vector<12x64xf32>
    %cst_121 = arith.constant 9.99999974E-6 : f32
    %319 = vector.broadcast %cst_121 : f32 to vector<1x64xf32>
    %320 = arith.addf %316, %319 : vector<1x64xf32>
    %321 = math.rsqrt %320 : vector<1x64xf32>
    %322 = vector.broadcast %321 : vector<1x64xf32> to vector<12x64xf32>
    %323 = arith.mulf %318, %322 : vector<12x64xf32>
    %324 = arith.addf %0, %323 : vector<12x64xf32>
    %cst_122 = arith.constant 2.000000e+01 : f32
    %325 = vector.broadcast %cst_122 : f32 to vector<12x64xf32>
    %326 = arith.cmpf ogt, %324, %325 : vector<12x64xf32>
    %cst_123 = arith.constant 2.000000e+01 : f32
    %327 = vector.broadcast %cst_123 : f32 to vector<12x64xf32>
    %328 = arith.minimumf %324, %327 : vector<12x64xf32>
    %329 = math.exp %328 : vector<12x64xf32>
    %330 = math.log1p %329 : vector<12x64xf32>
    %331 = arith.select %326, %324, %330 : vector<12x64xi1>, vector<12x64xf32>
    %c0_124 = arith.constant 0 : index
    %c0_125 = arith.constant 0 : index
    %332 = vector.load %arg5[%c0_124, %c0_125] : memref<12x64xf32, #tpu.memory_space<vmem>>, vector<12x64xf32>
    tpu.vector_store %arg5[%c0_124, %c0_125], %331 {strides = array<i32>} : memref<12x64xf32, #tpu.memory_space<vmem>>, vector<12x64xf32>,
    return
  }
}

</mosaic_0001>

<bundles_post_ra>
// kernel: tpu_custom_call.1
= control target key start
LH: loop header
LB: loop body
LE: loop exit
PB: predicated region body
PF: predicated region fallthrough
CT: control target
= control target key end

     0   :  { %vm119_vm0 = vcmask 261120   ;;  %vm31_vm1 = vcmask 523264   ;;  %s2647_s0 = inlined_call_operand.vmem [shape: f32[12,64], index: 0, kind: input, shape index: {}]   ;;  %s2648_s1 = inlined_call_operand.vmem [shape: f32[8,12,128], index: 1, kind: input, shape index: {}]   ;;  %s2649_s2 = inlined_call_operand.vmem [shape: f32[8,12,32], index: 2, kind: input, shape index: {}]   ;;  %s2650_s3 = inlined_call_operand.vmem [shape: f32[64,128], index: 3, kind: input, shape index: {}]   ;;  %s2651_s4 = inlined_call_operand.vmem [shape: f32[32,128], index: 4, kind: input, shape index: {}]   ;;  %s2652_s5 = inlined_call_operand.hbm [shape: f32[12,64], index: 5, kind: output, shape index: {}]  }
   0x1   :  { %v23_v0 = vld [vmem:[%s2650_s3] sm:$0xff]  ;;  %v24_v1 = vld [vmem:[%s2650_s3 + $0x8] sm:$0xff]  ;;  %v25_v5 = vld [vmem:[%s2650_s3 + $0x10] sm:$0xff] }
   0x2   :  { %v113_v2 = vld [vmem:[%s2651_s4] sm:$0xff]  ;;  %v1750_v3 = vpack.c.bf16 %v24_v1, %v23_v0  ;;  %v114_v4 = vld [vmem:[%s2651_s4 + $0x8] sm:$0xff]  ;;  %v26_v6 = vld [vmem:[%s2650_s3 + $0x18] sm:$0xff] }
   0x3   :  { %v2052_v7 = vpack.c.bf16 %v114_v4, %v113_v2  ;;  %v1754_v8 = vpack.c.bf16 %v26_v6, %v25_v5  ;;  %v115_v9 = vld [vmem:[%s2651_s4 + $0x10] sm:$0xff]  ;;  %v116_v10 = vld [vmem:[%s2651_s4 + $0x18] sm:$0xff]  ;;  %v27_v11 = vld [vmem:[%s2650_s3 + $0x20] sm:$0xff] }
   0x4   :  { %1751 = vmatprep.subr.bf16.mxu0 %v1750_v3  ;;  %v2063_v12 = vpack.c.bf16 %v116_v10, %v115_v9  ;;  %v28_v13 = vld [vmem:[%s2650_s3 + $0x28] sm:$0xff]  ;;  %v117_v14 = vld [vmem:[%s2649_s2] sm:$0xff]  ;;  %v29_v17 = vld [vmem:[%s2650_s3 + $0x30] sm:$0xff] }
   0x5   :  { %1767 = vmatprep.subr.bf16.mxu1 %v2052_v7  ;;  %1753 = vmatpush3.bf16.msra.mxu0 %v1750_v3  ;;  %v21_v15 = vld [vmem:[%s2647_s0] sm:$0xff]  ;;  %v1758_v16 = vpack.c.bf16 %v28_v13, %v27_v11  ;;  %v30_v18 = vld [vmem:[%s2650_s3 + $0x38] sm:$0xff]  ;;  %v118_v19 = vld [vmem:[%s2649_s2 + $0x8] sm:$0xf] }
   0x6   :  { %1769 = vmatpush3.bf16.msra.mxu1 %v2052_v7  ;;  %1755 = vmatprep.subr.bf16.mxu0 %v1754_v8  ;;  %v1762_v20 = vpack.c.bf16 %v30_v18, %v29_v17 }
   0x7   :  { %1771 = vmatprep.subr.bf16.mxu1 %v2063_v12  ;;  %1670 = vmatprep.mubr.msk.f32.mxu1 %vm119_vm0, %v117_v14 }
   0x8   :  { %1659 = vmatprep.mubr.msk.f32.mxu0 %vm31_vm1, %v21_v15 }
   0x9   :  { %1757 = vmatpush3.bf16.msra.mxu0 %v1754_v8 }
   0xa   :  { %1773 = vmatpush3.bf16.msra.mxu1 %v2063_v12  ;;  %1759 = vmatprep.subr.bf16.mxu0 %v1758_v16 }
   0xb   :  { %1775 = vmatprep.subr.bf16.mxu1 %v2052_v7 }
   0xc   :  { %10 = vsyncpa [#allocation3], 0  ;;  %v1543_v21 = vld [vmem:[%s2649_s2 + $0x10] sm:$0xff]  ;;  %v22_v22 = vld [vmem:[%s2647_s0 + $0x8] sm:$0xf]  ;;  %vm207_vm2 = vcmask 1043456  }
   0xd   :  { %1761 = vmatpush3.bf16.msra.mxu0 %v1758_v16  ;;  %1671 = vmatmul.mubr.msk.f32.vlgmr.msra.gmra.mrb[0].mxu1 %vm119_vm0, %v118_v19  ;;  %v1544_v23 = vld [vmem:[%s2649_s2 + $0x18] sm:$0xf]  ;;  %v1549_v24 = vld [vmem:[%s2649_s2 + $0x20] sm:$0xff]  ;;  %v1555_v25 = vld [vmem:[%s2649_s2 + $0x30] sm:$0xff] }
   0xe   :  { %1777 = vmatpush3.bf16.msra.mxu1 %v2052_v7  ;;  %1763 = vmatprep.subr.bf16.mxu0 %v1762_v20  ;;  %v1550_v26 = vld [vmem:[%s2649_s2 + $0x28] sm:$0xf]  ;;  %v1556_v27 = vld [vmem:[%s2649_s2 + $0x38] sm:$0xf]  ;;  %v1561_v28 = vld [vmem:[%s2649_s2 + $0x40] sm:$0xff] }
   0xf   :  { %1779 = vmatprep.subr.bf16.mxu1 %v2063_v12  ;;  %1681 = vmatprep.mubr.msk.f32.mxu1 %vm119_vm0, %v1543_v21  ;;  %v1567_v29 = vld [vmem:[%s2649_s2 + $0x50] sm:$0xff]  ;;  %v1562_v30 = vld [vmem:[%s2649_s2 + $0x48] sm:$0xf]  ;;  %v1568_v31 = vld [vmem:[%s2649_s2 + $0x58] sm:$0xf] }
  0x10   :  { %v1573_v32 = vld [vmem:[%s2649_s2 + $0x60] sm:$0xff]  ;;  %v1579_v33 = vld [vmem:[%s2649_s2 + $0x70] sm:$0xff]  ;;  %v1574_v34 = vld [vmem:[%s2649_s2 + $0x68] sm:$0xf] }
  0x11   :  { %1765 = vmatpush3.bf16.msra.mxu0 %v1762_v20  ;;  %v1580_v35 = vld [vmem:[%s2649_s2 + $0x78] sm:$0xf]  ;;  %v202_v38 = vld [vmem:[%s2648_s1 + $0x8] sm:$0xf]  ;;  %v201_v39 = vld [vmem:[%s2648_s1] sm:$0xff] }
  0x12   :  { %1781 = vmatpush3.bf16.msra.mxu1 %v2063_v12  ;;  %1783 = vmatprep.subr.bf16.mxu0 %v2052_v7  ;;  %v1548_v40 = vld [vmem:[%s2648_s1 + $0x18] sm:$0xf]  ;;  %v1554_v41 = vld [vmem:[%s2648_s1 + $0x28] sm:$0xf]  ;;  %v1547_v42 = vld [vmem:[%s2648_s1 + $0x10] sm:$0xff] }
  0x13   :  { %1791 = vmatprep.subr.bf16.mxu1 %v2052_v7  ;;  %v1560_v43 = vld [vmem:[%s2648_s1 + $0x38] sm:$0xf]  ;;  %v1553_v44 = vld [vmem:[%s2648_s1 + $0x20] sm:$0xff]  ;;  %v1559_v46 = vld [vmem:[%s2648_s1 + $0x30] sm:$0xff] }
  0x14   :  { %1660 = vmatmul.mubr.msk.f32.vlgmr.msra.gmra.mrb[0].mxu0 %vm31_vm1, %v22_v22  ;;  %v1566_v47 = vld [vmem:[%s2648_s1 + $0x48] sm:$0xf]  ;;  %v1572_v53 = vld [vmem:[%s2648_s1 + $0x58] sm:$0xf]  ;;  %v1565_v54 = vld [vmem:[%s2648_s1 + $0x40] sm:$0xff] }
  0x15   :  { %1682 = vmatmul.mubr.msk.f32.vlgmr.msra.gmra.mrb[2].mxu1 %vm119_vm0, %v1544_v23  ;;  %1785 = vmatpush3.bf16.msra.mxu0 %v2052_v7  ;;  %v1571_v4 = vld [vmem:[%s2648_s1 + $0x50] sm:$0xff]  ;;  %v1578_v5 = vld [vmem:[%s2648_s1 + $0x68] sm:$0xf]  ;;  %v1584_v14 = vld [vmem:[%s2648_s1 + $0x78] sm:$0xf] }
  0x16   :  { %1793 = vmatpush3.bf16.msra.mxu1 %v2052_v7  ;;  %1787 = vmatprep.subr.bf16.mxu0 %v2063_v12  ;;  %v1577_v15 = vld [vmem:[%s2648_s1 + $0x60] sm:$0xff]  ;;  %v1583_v16 = vld [vmem:[%s2648_s1 + $0x70] sm:$0xff]  ;;  %s2000_s1 = smov 64  }
  0x17   :  { %1795 = vmatprep.subr.bf16.mxu1 %v2063_v12  ;;  %1692 = vmatprep.mubr.msk.f32.mxu0 %vm119_vm0, %v1549_v24 }
  0x18   :  { %1703 = vmatprep.mubr.msk.f32.mxu1 %vm119_vm0, %v1555_v25 }
  0x19   :  { %1789 = vmatpush3.bf16.msra.mxu0 %v2063_v12 }
  0x1a   :  { %1797 = vmatpush3.bf16.msra.mxu1 %v2063_v12  ;;  %1799 = vmatprep.subr.bf16.mxu0 %v2052_v7 }
  0x1b   :  { %1807 = vmatprep.subr.bf16.mxu1 %v2052_v7 }
  0x1c   :  { %1693 = vmatmul.mubr.msk.f32.vlgmr.msra.gmra.mrb[2].mxu0 %vm119_vm0, %v1550_v26 }
  0x1d   :  { %1704 = vmatmul.mubr.msk.f32.vlgmr.msra.gmra.mrb[4].mxu1 %vm119_vm0, %v1556_v27  ;;  %1801 = vmatpush3.bf16.msra.mxu0 %v2052_v7 }
  0x1e   :  { %1809 = vmatpush3.bf16.msra.mxu1 %v2052_v7  ;;  %1803 = vmatprep.subr.bf16.mxu0 %v2063_v12 }
  0x1f   :  { %1811 = vmatprep.subr.bf16.mxu1 %v2063_v12  ;;  %1714 = vmatprep.mubr.msk.f32.mxu0 %vm119_vm0, %v1561_v28 }
  0x20   :  { %1725 = vmatprep.mubr.msk.f32.mxu1 %vm119_vm0, %v1567_v29 }
  0x21   :  { %1805 = vmatpush3.bf16.msra.mxu0 %v2063_v12 }
  0x22   :  { %1813 = vmatpush3.bf16.msra.mxu1 %v2063_v12  ;;  %1815 = vmatprep.subr.bf16.mxu0 %v2052_v7 }
  0x23   :  { %1823 = vmatprep.subr.bf16.mxu1 %v2052_v7 }
  0x24   :  { %1715 = vmatmul.mubr.msk.f32.vlgmr.msra.gmra.mrb[4].mxu0 %vm119_vm0, %v1562_v30 }
  0x25   :  { %1726 = vmatmul.mubr.msk.f32.vlgmr.msra.gmra.mrb[6].mxu1 %vm119_vm0, %v1568_v31  ;;  %1817 = vmatpush3.bf16.msra.mxu0 %v2052_v7 }
  0x26   :  { %1825 = vmatpush3.bf16.msra.mxu1 %v2052_v7  ;;  %1819 = vmatprep.subr.bf16.mxu0 %v2063_v12 }
  0x27   :  { %1827 = vmatprep.subr.bf16.mxu1 %v2063_v12  ;;  %1736 = vmatprep.mubr.msk.f32.mxu0 %vm119_vm0, %v1573_v32 }
  0x28   :  { %1747 = vmatprep.mubr.msk.f32.mxu1 %vm119_vm0, %v1579_v33 }
  0x29   :  { %1821 = vmatpush3.bf16.msra.mxu0 %v2063_v12 }
  0x2a   :  { %1829 = vmatpush3.bf16.msra.mxu1 %v2063_v12 }
  0x2c   :  { %1737 = vmatmul.mubr.msk.f32.vlgmr.msra.gmra.mrb[6].mxu0 %vm119_vm0, %v1574_v34 }
  0x2d   :  { %1748 = vmatmul.mubr.msk.f32.vlgmr.msra.gmra.mrb[8].mxu1 %vm119_vm0, %v1580_v35 }
  0xe0   :  { %v1672_v36 = vpop.f32.mrb[0].mxu1 }
  0xe1   :  { %v192_v37 = vpop.f32.mrb[1].mxu1 }
  0xe7   :  { %v1661_v45 = vpop.f32.mrb[0].mxu0 }
  0xe8   :  { %v204_v48 = vadd.f32 %v1661_v45, %v202_v38  ;;  %v104_v49 = vpop.f32.mrb[1].mxu0  ;;  %v1683_v50 = vpop.f32.mrb[2].mxu1  ;;  %v316_v51 = vadd.f32 %v1661_v45, %v1548_v40  ;;  %v427_v52 = vadd.f32 %v1661_v45, %v1554_v41  ;;  %v538_v58 = vadd.f32 %v1661_v45, %v1560_v43 }
  0xe9   :  { %v203_v55 = vadd.f32 %v201_v39, %v104_v49  ;;  %v303_v56 = vpop.f32.mrb[3].mxu1  ;;  %v315_v57 = vadd.f32 %v1547_v42, %v104_v49  ;;  %v426_v59 = vadd.f32 %v1553_v44, %v104_v49  ;;  %v537_v62 = vadd.f32 %v1559_v46, %v104_v49 }
  0xea   :  { %v2211_v60 = vadd.f32 %v1672_v36, %v204_v48  ;;  %v2213_v61 = vadd.f32 %v1683_v50, %v316_v51  ;;  %v2215_v63 = vadd.f32 %v1661_v45, %v1566_v47  ;;  %v2221_v2 = vadd.f32 %v1661_v45, %v1572_v53 }
  0xeb   :  { %v2217_v0 = vadd.f32 %v203_v55, %v192_v37  ;;  %v2219_v1 = vadd.f32 %v315_v57, %v303_v56  ;;  %v2223_v3 = vadd.f32 %v1565_v54, %v104_v49  ;;  %v2256_v19 = vadd.f32 %v1571_v4, %v104_v49 }
  0xec   :  { %v319_v6 = vsel %vm207_vm2, %v2213_v61, 0.0  ;;  %v329_v7 = vmul.f32 %v2213_v61, %v2213_v61  ;;  %v208_v8 = vsel %vm207_vm2, %v2211_v60, 0.0  ;;  %v218_v9 = vmul.f32 %v2211_v60, %v2211_v60 }
  0xed   :  { %v209_v10 = vadd.f32 %v208_v8, %v2217_v0  ;;  %v217_v11 = vmul.f32 %v2217_v0, %v2217_v0  ;;  %v320_v12 = vadd.f32 %v319_v6, %v2219_v1  ;;  %v328_v13 = vmul.f32 %v2219_v1, %v2219_v1 }
  0xee   :  { %v330_v17 = vsel %vm207_vm2, %v329_v7, 0.0  ;;  %v219_v18 = vsel %vm207_vm2, %v218_v9, 0.0  ;;  %v2258_v20 = vadd.f32 %v1661_v45, %v1578_v5  ;;  %v2262_v29 = vadd.f32 %v1661_v45, %v1584_v14 }
  0xef   :  { %v210_v21 = vrot.slane %v209_v10, 4  ;;  %v220_v22 = vadd.f32 %v219_v18, %v217_v11  ;;  %v321_v23 = vrot.slane %v320_v12, 4  ;;  %v331_v24 = vadd.f32 %v330_v17, %v328_v13  ;;  %v1694_v25 = vpop.f32.mrb[2].mxu0 }
  0xf0   :  { %v2260_v26 = vadd.f32 %v1694_v25, %v427_v52  ;;  %v1705_v27 = vpop.f32.mrb[4].mxu1  ;;  %v414_v28 = vpop.f32.mrb[3].mxu0  ;;  %v2264_v30 = vadd.f32 %v1577_v15, %v104_v49  ;;  %v2266_v31 = vadd.f32 %v1583_v16, %v104_v49 }
  0xf1   :  { %v211_v32 = vadd.f32 %v210_v21, %v209_v10  ;;  %v221_v33 = vrot.slane %v220_v22, 4  ;;  %v322_v34 = vadd.f32 %v321_v23, %v320_v12  ;;  %v332_v35 = vrot.slane %v331_v24, 4  ;;  %v525_v36 = vpop.f32.mrb[5].mxu1 }
  0xf2   :  { %v430_v37 = vsel %vm207_vm2, %v2260_v26, 0.0  ;;  %v440_v38 = vmul.f32 %v2260_v26, %v2260_v26  ;;  %v2272_v39 = vadd.f32 %v1705_v27, %v538_v58  ;;  %v2274_v40 = vadd.f32 %v426_v59, %v414_v28 }
  0xf3   :  { %v212_v41 = vrot.slane %v211_v32, 2  ;;  %v222_v42 = vadd.f32 %v221_v33, %v220_v22  ;;  %v323_v43 = vrot.slane %v322_v34, 2  ;;  %v333_v44 = vadd.f32 %v332_v35, %v331_v24 }
  0xf4   :  { %v441_v45 = vsel %vm207_vm2, %v440_v38, 0.0  ;;  %v541_v46 = vsel %vm207_vm2, %v2272_v39, 0.0  ;;  %v551_v47 = vmul.f32 %v2272_v39, %v2272_v39  ;;  %v431_v48 = vadd.f32 %v430_v37, %v2274_v40 }
  0xf5   :  { %v213_v49 = vadd.f32 %v212_v41, %v211_v32  ;;  %v223_v50 = vrot.slane %v222_v42, 2  ;;  %v324_v51 = vadd.f32 %v323_v43, %v322_v34  ;;  %v334_v52 = vrot.slane %v333_v44, 2 }
  0xf6   :  { %v552_v53 = vsel %vm207_vm2, %v551_v47, 0.0  ;;  %v432_v54 = vrot.slane %v431_v48, 4  ;;  %v439_v55 = vmul.f32 %v2274_v40, %v2274_v40  ;;  %v2285_v56 = vadd.f32 %v537_v62, %v525_v36 }
  0xf7   :  { %v214_v57 = vrot.slane %v213_v49, 1  ;;  %v224_v58 = vadd.f32 %v223_v50, %v222_v42  ;;  %v325_v59 = vrot.slane %v324_v51, 1  ;;  %v335_v4 = vadd.f32 %v334_v52, %v333_v44  ;;  %v1716_v5 = vpop.f32.mrb[4].mxu0 }
  0xf8   :  { %v433_v6 = vadd.f32 %v432_v54, %v431_v48  ;;  %v442_v7 = vadd.f32 %v441_v45, %v439_v55  ;;  %v542_v8 = vadd.f32 %v541_v46, %v2285_v56  ;;  %v550_v9 = vmul.f32 %v2285_v56, %v2285_v56  ;;  %v1727_v10 = vpop.f32.mrb[6].mxu1  ;;  %v636_v11 = vpop.f32.mrb[5].mxu0 }
  0xf9   :  { %v215_v12 = vadd.f32 %v214_v57, %v213_v49  ;;  %v225_v13 = vrot.slane %v224_v58, 1  ;;  %v326_v14 = vadd.f32 %v325_v59, %v324_v51  ;;  %v336_v15 = vrot.slane %v335_v4, 1  ;;  %v747_v62 = vpop.f32.mrb[7].mxu1 }
  0xfa   :  { %v434_v16 = vrot.slane %v433_v6, 2  ;;  %v443_v17 = vrot.slane %v442_v7, 4  ;;  %v543_v18 = vrot.slane %v542_v8, 4  ;;  %v553_v21 = vadd.f32 %v552_v53, %v550_v9 }
  0xfb   :  { %v226_v22 = vadd.f32 %v225_v13, %v224_v58  ;;  %v327_v23 = vadd.f32 %v326_v14, %v215_v12  ;;  %v337_v24 = vadd.f32 %v336_v15, %v335_v4  ;;  %v2291_v25 = vadd.f32 %v1716_v5, %v2215_v63 }
  0xfc   :  { %v435_v27 = vadd.f32 %v434_v16, %v433_v6  ;;  %v444_v28 = vadd.f32 %v443_v17, %v442_v7  ;;  %v544_v32 = vadd.f32 %v543_v18, %v542_v8  ;;  %v554_v33 = vrot.slane %v553_v21, 4 }
  0xfd   :  { %v338_v34 = vadd.f32 %v337_v24, %v226_v22  ;;  %v652_v35 = vsel %vm207_vm2, %v2291_v25, 0.0  ;;  %v662_v36 = vmul.f32 %v2291_v25, %v2291_v25  ;;  %v2298_v37 = vadd.f32 %v1727_v10, %v2221_v2 }
  0xfe   :  { %v436_v38 = vrot.slane %v435_v27, 1  ;;  %v445_v41 = vrot.slane %v444_v28, 2  ;;  %v545_v42 = vrot.slane %v544_v32, 2  ;;  %v555_v43 = vadd.f32 %v554_v33, %v553_v21 }
  0xff   :  { %v663_v63 = vsel %vm207_vm2, %v662_v36, 0.0  ;;  %v763_v44 = vsel %vm207_vm2, %v2298_v37, 0.0  ;;  %v773_v45 = vmul.f32 %v2298_v37, %v2298_v37  ;;  %v2306_v46 = vadd.f32 %v2223_v3, %v636_v11  ;;  %v1738_v47 = vpop.f32.mrb[6].mxu0 }
 0x100   :  { %v437_v48 = vadd.f32 %v436_v38, %v435_v27  ;;  %v446_v49 = vadd.f32 %v445_v41, %v444_v28  ;;  %v546_v2 = vadd.f32 %v545_v42, %v544_v32  ;;  %v556_v50 = vrot.slane %v555_v43, 2  ;;  %v1749_v51 = vpop.f32.mrb[8].mxu1  ;;  %v858_v52 = vpop.f32.mrb[7].mxu0 }
 0x101   :  { %v774_v53 = vsel %vm207_vm2, %v773_v45, 0.0  ;;  %v653_v54 = vadd.f32 %v652_v35, %v2306_v46  ;;  %v661_v55 = vmul.f32 %v2306_v46, %v2306_v46  ;;  %v2313_v57 = vadd.f32 %v2256_v19, %v747_v62  ;;  %v969_v58 = vpop.f32.mrb[9].mxu1 }
 0x102   :  { %v438_v3 = vadd.f32 %v437_v48, %v327_v23  ;;  %v447_v59 = vrot.slane %v446_v49, 1  ;;  %v547_v4 = vrot.slane %v546_v2, 1  ;;  %v557_v5 = vadd.f32 %v556_v50, %v555_v43 }
 0x103   :  { %v654_v6 = vrot.slane %v653_v54, 4  ;;  %v664_v7 = vadd.f32 %v663_v63, %v661_v55  ;;  %v764_v8 = vadd.f32 %v763_v44, %v2313_v57  ;;  %v772_v9 = vmul.f32 %v2313_v57, %v2313_v57 }
 0x104   :  { %v448_v10 = vadd.f32 %v447_v59, %v446_v49  ;;  %v548_v11 = vadd.f32 %v547_v4, %v546_v2  ;;  %v558_v12 = vrot.slane %v557_v5, 1  ;;  %v2319_v13 = vadd.f32 %v1738_v47, %v2258_v20 }
 0x105   :  { %v655_v19 = vadd.f32 %v654_v6, %v653_v54  ;;  %v665_v14 = vrot.slane %v664_v7, 4  ;;  %v765_v15 = vrot.slane %v764_v8, 4  ;;  %v775_v62 = vadd.f32 %v774_v53, %v772_v9 }
 0x106   :  { %v449_v16 = vadd.f32 %v448_v10, %v338_v34  ;;  %v549_v17 = vadd.f32 %v548_v11, %v438_v3  ;;  %v559_v18 = vadd.f32 %v558_v12, %v557_v5  ;;  %v874_v21 = vsel %vm207_vm2, %v2319_v13, 0.0 }
 0x107   :  { %v656_v22 = vrot.slane %v655_v19, 2  ;;  %v666_v23 = vadd.f32 %v665_v14, %v664_v7  ;;  %v766_v24 = vadd.f32 %v765_v15, %v764_v8  ;;  %v776_v27 = vrot.slane %v775_v62, 4 }
 0x108   :  { %v560_v28 = vadd.f32 %v559_v18, %v449_v16  ;;  %v884_v32 = vmul.f32 %v2319_v13, %v2319_v13  ;;  %v2326_v20 = vadd.f32 %v1749_v51, %v2262_v29  ;;  %v2329_v33 = vadd.f32 %v2264_v30, %v858_v52 }
 0x109   :  { %v657_v34 = vadd.f32 %v656_v22, %v655_v19  ;;  %v667_v35 = vrot.slane %v666_v23, 2  ;;  %v767_v36 = vrot.slane %v766_v24, 2  ;;  %v777_v38 = vadd.f32 %v776_v27, %v775_v62 }
 0x10a   :  { %v885_v41 = vsel %vm207_vm2, %v884_v32, 0.0  ;;  %v985_v42 = vsel %vm207_vm2, %v2326_v20, 0.0  ;;  %v995_v43 = vmul.f32 %v2326_v20, %v2326_v20  ;;  %v875_v63 = vadd.f32 %v874_v21, %v2329_v33 }
 0x10b   :  { %v658_v44 = vrot.slane %v657_v34, 1  ;;  %v668_v29 = vadd.f32 %v667_v35, %v666_v23  ;;  %v768_v45 = vadd.f32 %v767_v36, %v766_v24  ;;  %v778_v47 = vrot.slane %v777_v38, 2 }
 0x10c   :  { %v996_v30 = vsel %vm207_vm2, %v995_v43, 0.0  ;;  %v876_v48 = vrot.slane %v875_v63, 4  ;;  %v883_v49 = vmul.f32 %v2329_v33, %v2329_v33  ;;  %v2341_v2 = vadd.f32 %v2266_v31, %v969_v58 }
 0x10d   :  { %v659_v50 = vadd.f32 %v658_v44, %v657_v34  ;;  %v669_v51 = vrot.slane %v668_v29, 1  ;;  %v769_v52 = vrot.slane %v768_v45, 1  ;;  %v779_v53 = vadd.f32 %v778_v47, %v777_v38 }
 0x10e   :  { %v877_v54 = vadd.f32 %v876_v48, %v875_v63  ;;  %v886_v55 = vadd.f32 %v885_v41, %v883_v49  ;;  %v986_v3 = vadd.f32 %v985_v42, %v2341_v2  ;;  %v994_v59 = vmul.f32 %v2341_v2, %v2341_v2 }
 0x10f   :  { %v660_v4 = vadd.f32 %v659_v50, %v549_v17  ;;  %v670_v5 = vadd.f32 %v669_v51, %v668_v29  ;;  %v770_v6 = vadd.f32 %v769_v52, %v768_v45  ;;  %v780_v7 = vrot.slane %v779_v53, 1 }
 0x110   :  { %v878_v8 = vrot.slane %v877_v54, 2  ;;  %v887_v9 = vrot.slane %v886_v55, 4  ;;  %v987_v10 = vrot.slane %v986_v3, 4  ;;  %v997_v31 = vadd.f32 %v996_v30, %v994_v59 }
 0x111   :  { %v671_v58 = vadd.f32 %v670_v5, %v560_v28  ;;  %v771_v11 = vadd.f32 %v770_v6, %v660_v4  ;;  %v781_v12 = vadd.f32 %v780_v7, %v779_v53 }
 0x112   :  { %v879_v19 = vadd.f32 %v878_v8, %v877_v54  ;;  %v888_v14 = vadd.f32 %v887_v9, %v886_v55  ;;  %v988_v15 = vadd.f32 %v987_v10, %v986_v3  ;;  %v998_v62 = vrot.slane %v997_v31, 4 }
 0x113   :  { %v782_v16 = vadd.f32 %v781_v12, %v671_v58 }
 0x114   :  { %v880_v18 = vrot.slane %v879_v19, 1  ;;  %v889_v21 = vrot.slane %v888_v14, 2  ;;  %v989_v22 = vrot.slane %v988_v15, 2  ;;  %v999_v23 = vadd.f32 %v998_v62, %v997_v31 }
 0x116   :  { %v881_v17 = vadd.f32 %v880_v18, %v879_v19  ;;  %v890_v24 = vadd.f32 %v889_v21, %v888_v14  ;;  %v990_v27 = vadd.f32 %v989_v22, %v988_v15  ;;  %v1000_v32 = vrot.slane %v999_v23, 2 }
 0x118   :  { %v882_v34 = vadd.f32 %v881_v17, %v771_v11  ;;  %v891_v35 = vrot.slane %v890_v24, 1  ;;  %v991_v36 = vrot.slane %v990_v27, 1  ;;  %v1001_v38 = vadd.f32 %v1000_v32, %v999_v23 }
 0x11a   :  { %v892_v28 = vadd.f32 %v891_v35, %v890_v24  ;;  %v992_v41 = vadd.f32 %v991_v36, %v990_v27  ;;  %v1002_v42 = vrot.slane %v1001_v38, 1 }
 0x11c   :  { %v893_v43 = vadd.f32 %v892_v28, %v782_v16  ;;  %v993_v63 = vadd.f32 %v992_v41, %v882_v34  ;;  %v1003_v44 = vadd.f32 %v1002_v42, %v1001_v38 }
 0x11e   :  { %v1004_v29 = vadd.f32 %v1003_v44, %v893_v43  ;;  %v2346_v45 = vmul.f32 0.010416667, %v993_v63 }
 0x120   :  { %v1007_v47 = vmul.f32 0.010416667, %v1004_v29  ;;  %v1008_v30 = vmul.f32 %v2346_v45, %v2346_v45  ;;  %v1405_v48 = vsub.f32 %v2341_v2, %v2346_v45  ;;  %v1069_v49 = vsub.f32 %v2219_v1, %v2346_v45 }
 0x121   :  { %v1013_v50 = vsub.f32 %v2217_v0, %v2346_v45  ;;  %v1070_v51 = vsub.f32 %v2213_v61, %v2346_v45  ;;  %v1014_v52 = vsub.f32 %v2211_v60, %v2346_v45  ;;  %v1126_v53 = vsub.f32 %v2260_v26, %v2346_v45 }
 0x122   :  { %v1009_v54 = vsub.f32 %v1007_v47, %v1008_v30  ;;  %v1125_v55 = vsub.f32 %v2274_v40, %v2346_v45  ;;  %v1182_v2 = vsub.f32 %v2272_v39, %v2346_v45  ;;  %v1181_v1 = vsub.f32 %v2285_v56, %v2346_v45 }
 0x123   :  { %v1238_v0 = vsub.f32 %v2291_v25, %v2346_v45  ;;  %v1237_v61 = vsub.f32 %v2306_v46, %v2346_v45  ;;  %v1294_v60 = vsub.f32 %v2298_v37, %v2346_v45  ;;  %v1293_v26 = vsub.f32 %v2313_v57, %v2346_v45 }
 0x124   :  { %v1010_v3 = vmax.f32 %v1009_v54, 0.0  ;;  %v1350_v40 = vsub.f32 %v2319_v13, %v2346_v45  ;;  %v1349_v39 = vsub.f32 %v2329_v33, %v2346_v45  ;;  %v1406_v56 = vsub.f32 %v2326_v20, %v2346_v45 }
 0x126   :  { %v1011_v25 = vadd.f32 1e-05, %v1010_v3 }
 0x128   :  { %1834 = vrsqrt.f32 %v1011_v25 }
 0x132   :  { %v1835_v59 = vpop.eup %1834 }
 0x133   :  { %v2382_v46 = vmul.f32 %v1835_v59, %v1405_v48  ;;  %v2384_v4 = vmul.f32 %v1835_v59, %v1069_v49  ;;  %v2386_v37 = vmul.f32 %v1835_v59, %v1013_v50  ;;  %v2388_v57 = vmul.f32 %v1835_v59, %v1070_v51 }
 0x134   :  { %v2390_v5 = vmul.f32 %v1835_v59, %v1014_v52  ;;  %v2392_v13 = vmul.f32 %v1835_v59, %v1126_v53  ;;  %v2394_v6 = vmul.f32 %v1835_v59, %v1125_v55  ;;  %v2396_v33 = vmul.f32 %v1835_v59, %v1182_v2 }
 0x135   :  { %v1087_v20 = vmin.f32 %v2384_v4, 20.0  ;;  %v1031_v7 = vmin.f32 %v2386_v37, 20.0  ;;  %v1088_v8 = vmin.f32 %v2388_v57, 20.0  ;;  %v1423_v62 = vmin.f32 %v2382_v46, 20.0 }
 0x136   :  { %v1032_v10 = vmin.f32 %v2390_v5, 20.0  ;;  %v1144_v11 = vmin.f32 %v2392_v13, 20.0  ;;  %v1143_v19 = vmin.f32 %v2394_v6, 20.0  ;;  %v1200_v15 = vmin.f32 %v2396_v33, 20.0 }
 0x137   :  { %v1089_v9 = vmul.f32 1.442695, %v1087_v20  ;;  %v1033_v31 = vmul.f32 1.442695, %v1031_v7  ;;  %v1091_v58 = vmul.f32 1.442695, %v1088_v8  ;;  %v2406_v16 = vmul.f32 %v1835_v59, %v1181_v1 }
 0x138   :  { %v1035_v12 = vmul.f32 1.442695, %v1032_v10  ;;  %v1147_v14 = vmul.f32 1.442695, %v1144_v11  ;;  %v2408_v18 = vmul.f32 %v1835_v59, %v1238_v0  ;;  %v1145_v21 = vmul.f32 1.442695, %v1143_v19 }
 0x139   :  { %1836 = vpow2.f32 %v1089_v9  ;;  %v2410_v22 = vmul.f32 %v1835_v59, %v1237_v61  ;;  %v2412_v23 = vmul.f32 %v1835_v59, %v1294_v60  ;;  %v1203_v17 = vmul.f32 1.442695, %v1200_v15 }
 0x13a   :  { %1838 = vpow2.f32 %v1033_v31  ;;  %v1199_v24 = vmin.f32 %v2406_v16, 20.0  ;;  %v1256_v27 = vmin.f32 %v2408_v18, 20.0  ;;  %v1425_v35 = vmul.f32 1.442695, %v1423_v62 }
 0x13b   :  { %1840 = vpow2.f32 %v1091_v58  ;;  %v1255_v32 = vmin.f32 %v2410_v22, 20.0  ;;  %v2417_v36 = vmul.f32 %v1835_v59, %v1293_v26  ;;  %v2419_v28 = vmul.f32 %v1835_v59, %v1350_v40 }
 0x13c   :  { %1842 = vpow2.f32 %v1035_v12  ;;  %v1201_v34 = vmul.f32 1.442695, %v1199_v24  ;;  %v1259_v38 = vmul.f32 1.442695, %v1256_v27  ;;  %v2421_v41 = vmul.f32 %v1835_v59, %v1349_v39 }
 0x13d   :  { %1844 = vpow2.f32 %v1147_v14  ;;  %v1257_v42 = vmul.f32 1.442695, %v1255_v32  ;;  %v1312_v43 = vmin.f32 %v2412_v23, 20.0  ;;  %v2424_v63 = vmul.f32 %v1835_v59, %v1406_v56 }
 0x13e   :  { %1846 = vpow2.f32 %v1145_v21  ;;  %v1311_v47 = vmin.f32 %v2417_v36, 20.0  ;;  %v1368_v50 = vmin.f32 %v2419_v28, 20.0  ;;  %v1367_v3 = vmin.f32 %v2421_v41, 20.0 }
 0x13f   :  { %1848 = vpow2.f32 %v1203_v17  ;;  %v1315_v49 = vmul.f32 1.442695, %v1312_v43  ;;  %vm1085_vm3 = vcmp.gt.f32.partialorder %v2384_v4, 20.0  ;;  %vm1029_vm4 = vcmp.gt.f32.partialorder %v2386_v37, 20.0 }
 0x140   :  { %1850 = vpow2.f32 %v1201_v34  ;;  %v1313_v0 = vmul.f32 1.442695, %v1311_v47  ;;  %v2432_v26 = vmul.f32 1.442695, %v1368_v50  ;;  %vm1086_vm7 = vcmp.gt.f32.partialorder %v2388_v57, 20.0 }
 0x141   :  { %1852 = vpow2.f32 %v1425_v35  ;;  %vm1030_vm9 = vcmp.gt.f32.partialorder %v2390_v5, 20.0  ;;  %vm1142_vm12 = vcmp.gt.f32.partialorder %v2392_v13, 20.0  ;;  %vm1141_vm13 = vcmp.gt.f32.partialorder %v2394_v6, 20.0 }
 0x142   :  { %1854 = vpow2.f32 %v1259_v38  ;;  %vm1198_vm15 = vcmp.gt.f32.partialorder %v2396_v33, 20.0  ;;  %vm1197_vm0 = vcmp.gt.f32.partialorder %v2406_v16, 20.0 }
 0x143   :  { %v1837_v44 = vpop.eup %1836  ;;  %1856 = vpow2.f32 %v1257_v42 }
 0x144   :  { %v1839_v29 = vpop.eup %1838  ;;  %v1093_v45 = vadd.f32 1.0, %v1837_v44  ;;  %v1096_v54 = vmul.f32 -0.5, %v1837_v44  ;;  %v1099_v60 = vand.u32 2147483647, %v1837_v44 }
 0x145   :  { %v1841_v30 = vpop.eup %1840  ;;  %v1037_v48 = vadd.f32 1.0, %v1839_v29  ;;  %v1040_v55 = vmul.f32 -0.5, %v1839_v29  ;;  %v1043_v39 = vand.u32 2147483647, %v1839_v29 }
 0x146   :  { %v1843_v51 = vpop.eup %1842  ;;  %1858 = vlog2.f32 %v1093_v45  ;;  %v1102_v52 = vadd.f32 1.0, %v1841_v30  ;;  %v1105_v2 = vmul.f32 -0.5, %v1841_v30  ;;  %v1097_v59 = vadd.f32 1.0, %v1096_v54 }
 0x147   :  { %v2428_v53 = vpop.eup %1844  ;;  %1860 = vlog2.f32 %v1037_v48  ;;  %v1046_v1 = vadd.f32 1.0, %v1843_v51  ;;  %v1049_v56 = vmul.f32 -0.5, %v1843_v51  ;;  %v1041_v20 = vadd.f32 1.0, %v1040_v55 }
 0x148   :  { %1862 = vlog2.f32 %v1102_v52  ;;  %v2430_v61 = vpop.eup %1846  ;;  %v1158_v25 = vadd.f32 1.0, %v2428_v53  ;;  %v1106_v7 = vadd.f32 1.0, %v1105_v2  ;;  %v1108_v8 = vand.u32 2147483647, %v1841_v30 }
 0x149   :  { %1864 = vpow2.f32 %v1315_v49  ;;  %v2435_v40 = vpop.eup %1848  ;;  %v1052_v10 = vand.u32 2147483647, %v1843_v51  ;;  %v1161_v31 = vmul.f32 -0.5, %v2428_v53  ;;  %v1149_v58 = vadd.f32 1.0, %v2430_v61 }
 0x14a   :  { %1866 = vlog2.f32 %v1046_v1  ;;  %v2439_v9 = vpop.eup %1850  ;;  %vm2446_vm5 = vcmp.lt.f32.partialorder %v1099_v60, 0.0004427343  ;;  %v1164_v19 = vand.u32 2147483647, %v2428_v53  ;;  %v1214_v14 = vadd.f32 1.0, %v2435_v40 }
 0x14b   :  { %1868 = vlog2.f32 %v1158_v25  ;;  %v2444_v11 = vpop.eup %1852  ;;  %vm2454_vm6 = vcmp.lt.f32.partialorder %v1043_v39, 0.0004427343  ;;  %v1050_v21 = vadd.f32 1.0, %v1049_v56  ;;  %v1152_v17 = vmul.f32 -0.5, %v2430_v61 }
 0x14c   :  { %1870 = vpow2.f32 %v1313_v0  ;;  %v2452_v15 = vpop.eup %1854  ;;  %v1098_v27 = vmul.f32 %v1837_v44, %v1097_v59  ;;  %v1042_v32 = vmul.f32 %v1839_v29, %v1041_v20  ;;  %v1205_v34 = vadd.f32 1.0, %v2439_v9 }
 0x14d   :  { %1872 = vlog2.f32 %v1149_v58  ;;  %v2459_v24 = vpop.eup %1856  ;;  %v1107_v38 = vmul.f32 %v1841_v30, %v1106_v7  ;;  %vm2463_vm8 = vcmp.lt.f32.partialorder %v1108_v8, 0.0004427343  ;;  %vm2468_vm10 = vcmp.lt.f32.partialorder %v1052_v10, 0.0004427343 }
 0x14e   :  { %1874 = vlog2.f32 %v1214_v14  ;;  %v1162_v45 = vadd.f32 1.0, %v1161_v31  ;;  %vm2472_vm11 = vcmp.lt.f32.partialorder %v1164_v19, 0.0004427343  ;;  %v1270_v30 = vadd.f32 1.0, %v2452_v15 }
 0x14f   :  { %1876 = vlog2.f32 %v1205_v34  ;;  %v1051_v50 = vmul.f32 %v1843_v51, %v1050_v21  ;;  %v1153_v52 = vadd.f32 1.0, %v1152_v17  ;;  %v1155_v54 = vand.u32 2147483647, %v2430_v61 }
 0x150   :  { %v1859_v35 = vpop.eup %1858  ;;  %v1217_v0 = vmul.f32 -0.5, %v2435_v40  ;;  %1878 = vlog2.f32 %v1270_v30  ;;  %v1163_v56 = vmul.f32 %v2428_v53, %v1162_v45  ;;  %v1208_v25 = vmul.f32 -0.5, %v2439_v9 }
 0x151   :  { %v1861_v44 = vpop.eup %1860  ;;  %v1095_v29 = vmul.f32 0.6931472, %v1859_v35  ;;  %v1220_v8 = vand.u32 2147483647, %v2435_v40  ;;  %v1154_v53 = vmul.f32 %v2430_v61, %v1153_v52  ;;  %vm2501_vm14 = vcmp.lt.f32.partialorder %v1155_v54, 0.0004427343 }
 0x152   :  { %v1863_v48 = vpop.eup %1862  ;;  %v1039_v49 = vmul.f32 0.6931472, %v1861_v44  ;;  %v1273_v58 = vmul.f32 -0.5, %v2452_v15  ;;  %v1261_v12 = vadd.f32 1.0, %v2459_v24  ;;  %v1218_v21 = vadd.f32 1.0, %v1217_v0 }
 0x153   :  { %v2478_v55 = vpop.eup %1864  ;;  %v1101_v2 = vsel %vm2446_vm5, %v1098_v27, %v1095_v29  ;;  %v1104_v1 = vmul.f32 0.6931472, %v1863_v48  ;;  %v1211_v17 = vand.u32 2147483647, %v2439_v9  ;;  %vm2524_vm2 = vcmp.lt.f32.partialorder %v1220_v8, 0.0004427343 }
 0x154   :  { %v1867_v60 = vpop.eup %1866  ;;  %v1111_v39 = vsel %vm1085_vm3, %v2384_v4, %v1101_v2  ;;  %v1045_v51 = vsel %vm2454_vm6, %v1042_v32, %v1039_v49  ;;  %v1209_v32 = vadd.f32 1.0, %v1208_v25  ;;  %1880 = vlog2.f32 %v1261_v12 }
 0x155   :  { %1115 = vrot.lane.b32.xlu1 %v1111_v39, %s2000_s1  ;;  %v1055_v59 = vsel %vm1029_vm4, %v2386_v37, %v1045_v51  ;;  %v1110_v20 = vsel %vm2463_vm8, %v1107_v38, %v1104_v1  ;;  %v1048_v7 = vmul.f32 0.6931472, %v1867_v60  ;;  %v1869_v10 = vpop.eup %1868  ;;  %v1326_v34 = vadd.f32 1.0, %v2478_v55 }
 0x156   :  { %1059 = vrot.lane.b32.xlu0 %v1055_v59, %s2000_s1  ;;  %v2507_v19 = vpop.eup %1870  ;;  %v1160_v62 = vmul.f32 0.6931472, %v1869_v10  ;;  %v1112_v27 = vsel %vm1086_vm7, %v2388_v57, %v1110_v20  ;;  %v1274_v29 = vadd.f32 1.0, %v1273_v58  ;;  %v1276_v30 = vand.u32 2147483647, %v2452_v15 }
 0x157   :  { %v1054_v14 = vsel %vm2468_vm10, %v1051_v50, %v1048_v7  ;;  %v1873_v61 = vpop.eup %1872  ;;  %1882 = vlog2.f32 %v1326_v34  ;;  %v1219_v50 = vmul.f32 %v2435_v40, %v1218_v21  ;;  %v1264_v47 = vmul.f32 -0.5, %v2459_v24 }
 0x158   :  { %v1875_v35 = vpop.eup %1874  ;;  %v1056_v38 = vsel %vm1030_vm9, %v2390_v5, %v1054_v14  ;;  %v1166_v42 = vsel %vm2472_vm11, %v1163_v56, %v1160_v62  ;;  %v1151_v43 = vmul.f32 0.6931472, %v1873_v61  ;;  %v1317_v52 = vadd.f32 1.0, %v2507_v19 }
 0x159   :  { %1117 = vrot.lane.b32.xlu1 %v1112_v27, %s2000_s1  ;;  %v1216_v44 = vmul.f32 0.6931472, %v1875_v35  ;;  %v1877_v48 = vpop.eup %1876  ;;  %v1168_v54 = vsel %vm1142_vm12, %v2392_v13, %v1166_v42  ;;  %v1210_v1 = vmul.f32 %v2439_v9, %v1209_v32  ;;  %v1329_v0 = vmul.f32 -0.5, %v2478_v55 }
 0x15a   :  { %1061 = vrot.lane.b32.xlu0 %v1056_v38, %s2000_s1  ;;  %v1157_v49 = vsel %vm2501_vm14, %v1154_v53, %v1151_v43  ;;  %v1207_v2 = vmul.f32 0.6931472, %v1877_v48  ;;  %v1879_v60 = vpop.eup %1878  ;;  %vm2546_vm3 = vcmp.lt.f32.partialorder %v1211_v17, 0.0004427343  ;;  %1884 = vlog2.f32 %v1317_v52 }
 0x15b   :  { %v1167_v40 = vsel %vm1141_vm13, %v2394_v6, %v1157_v49  ;;  %v1222_v39 = vsel %vm2524_vm2, %v1219_v50, %v1216_v44  ;;  %v1272_v56 = vmul.f32 0.6931472, %v1879_v60  ;;  %v1275_v25 = vmul.f32 %v2452_v15, %v1274_v29 }
 0x15c   :  { %v1213_v9 = vsel %vm2546_vm3, %v1210_v1, %v1207_v2  ;;  %vm2554_vm4 = vcmp.lt.f32.partialorder %v1276_v30, 0.0004427343  ;;  %v1265_v20 = vadd.f32 1.0, %v1264_v47  ;;  %1886 = vpow2.f32 %v2432_v26 }
 0x15d   :  { %1173 = vrot.lane.b32.xlu1 %v1168_v54, %s2000_s1  ;;  %v1369_v7 = vmul.f32 1.442695, %v1367_v3  ;;  %v1424_v8 = vmin.f32 %v2424_v63, 20.0  ;;  %v1224_v10 = vsel %vm1198_vm15, %v2396_v33, %v1222_v39  ;;  %v1267_v53 = vand.u32 2147483647, %v2459_v24 }
 0x15e   :  { %1171 = vrot.lane.b32.xlu0 %v1167_v40, %s2000_s1  ;;  %v1330_v31 = vadd.f32 1.0, %v1329_v0  ;;  %v1320_v15 = vmul.f32 -0.5, %v2507_v19  ;;  %v1223_v26 = vsel %vm1197_vm0, %v2406_v16, %v1213_v9  ;;  %v1278_v3 = vsel %vm2554_vm4, %v1275_v25, %v1272_v56  ;;  %v1881_v12 = vpop.eup %1880 }
 0x15f   :  { %1888 = vpow2.f32 %v1369_v7  ;;  %v1427_v58 = vmul.f32 1.442695, %v1424_v8  ;;  %v1332_v14 = vand.u32 2147483647, %v2478_v55  ;;  %vm1254_vm5 = vcmp.gt.f32.partialorder %v2408_v18, 20.0 }
 0x160   :  { %v1263_v62 = vmul.f32 0.6931472, %v1881_v12  ;;  %v1266_v21 = vmul.f32 %v2459_v24, %v1265_v20  ;;  %v1280_v61 = vsel %vm1254_vm5, %v2408_v18, %v1278_v3  ;;  %vm1253_vm6 = vcmp.gt.f32.partialorder %v2410_v22, 20.0 }
 0x161   :  { %1229 = vrot.lane.b32.xlu1 %v1224_v10, %s2000_s1  ;;  %1890 = vpow2.f32 %v1427_v58  ;;  %v1883_v17 = vpop.eup %1882  ;;  %vm1268_vm7 = vcmp.lt.f32.partialorder %v1267_v53, 0.0004427343  ;;  %v1321_v27 = vadd.f32 1.0, %v1320_v15  ;;  %v1331_v35 = vmul.f32 %v2478_v55, %v1330_v31 }
 0x162   :  { %1227 = vrot.lane.b32.xlu0 %v1223_v26, %s2000_s1  ;;  %v1269_v32 = vsel %vm1268_vm7, %v1266_v21, %v1263_v62  ;;  %v1328_v34 = vmul.f32 0.6931472, %v1883_v17  ;;  %v1323_v38 = vand.u32 2147483647, %v2507_v19  ;;  %vm1333_vm8 = vcmp.lt.f32.partialorder %v1332_v14, 0.0004427343 }
 0x163   :  { %v1279_v42 = vsel %vm1253_vm6, %v2410_v22, %v1269_v32  ;;  %vm1310_vm9 = vcmp.gt.f32.partialorder %v2412_v23, 20.0  ;;  %v1429_v45 = vadd.f32 1.0, %v2444_v11  ;;  %v1322_v30 = vmul.f32 %v2507_v19, %v1321_v27 }
 0x164   :  { %v1885_v24 = vpop.eup %1884  ;;  %v1334_v43 = vsel %vm1333_vm8, %v1331_v35, %v1328_v34  ;;  %vm1324_vm10 = vcmp.lt.f32.partialorder %v1323_v38, 0.0004427343  ;;  %vm1309_vm11 = vcmp.gt.f32.partialorder %v2417_v36, 20.0  ;;  %v1432_v40 = vmul.f32 -0.5, %v2444_v11 }
 0x165   :  { %1285 = vrot.lane.b32.xlu1 %v1280_v61, %s2000_s1  ;;  %v1336_v44 = vsel %vm1310_vm9, %v2412_v23, %v1334_v43  ;;  %v1319_v29 = vmul.f32 0.6931472, %v1885_v24  ;;  %1892 = vlog2.f32 %v1429_v45  ;;  %vm1366_vm12 = vcmp.gt.f32.partialorder %v2419_v28, 20.0 }
 0x166   :  { %1283 = vrot.lane.b32.xlu0 %v1279_v42, %s2000_s1  ;;  %v1887_v48 = vpop.eup %1886  ;;  %v1433_v8 = vadd.f32 1.0, %v1432_v40  ;;  %v1435_v31 = vand.u32 2147483647, %v2444_v11  ;;  %vm1365_vm14 = vcmp.gt.f32.partialorder %v2421_v41, 20.0  ;;  %vm1422_vm3 = vcmp.gt.f32.partialorder %v2424_v63, 20.0 }
 0x167   :  { %v1325_v55 = vsel %vm1324_vm10, %v1322_v30, %v1319_v29  ;;  %v1382_v49 = vadd.f32 1.0, %v1887_v48  ;;  %v1385_v19 = vmul.f32 -0.5, %v1887_v48  ;;  %v1388_v39 = vand.u32 2147483647, %v1887_v48 }
 0x168   :  { %v1335_v47 = vsel %vm1309_vm11, %v2417_v36, %v1325_v55  ;;  %v1434_v61 = vmul.f32 %v2444_v11, %v1433_v8  ;;  %vm1436_vm2 = vcmp.lt.f32.partialorder %v1435_v31, 0.0004427343  ;;  %vm1421_vm4 = vcmp.gt.f32.partialorder %v2382_v46, 20.0 }
 0x169   :  { %1341 = vrot.lane.b32.xlu1 %v1336_v44, %s2000_s1  ;;  %v1889_v50 = vpop.eup %1888  ;;  %1894 = vlog2.f32 %v1382_v49  ;;  %v1386_v0 = vadd.f32 1.0, %v1385_v19  ;;  %vm1389_vm13 = vcmp.lt.f32.partialorder %v1388_v39, 0.0004427343  ;;  %v1073_v11 = vsub.f32 0.0, %v2384_v4 }
 0x16a   :  { %1339 = vrot.lane.b32.xlu0 %v1335_v47, %s2000_s1  ;;  %v1373_v52 = vadd.f32 1.0, %v1889_v50  ;;  %v1376_v1 = vmul.f32 -0.5, %v1889_v50  ;;  %v1379_v25 = vand.u32 2147483647, %v1889_v50  ;;  %v1017_v42 = vsub.f32 0.0, %v2386_v37 }
 0x16b   :  { %v1891_v54 = vpop.eup %1890  ;;  %v1387_v20 = vmul.f32 %v1887_v48, %v1386_v0  ;;  %v1075_v24 = vmul.f32 1.442695, %v1073_v11  ;;  %v1074_v45 = vsub.f32 0.0, %v2388_v57  ;;  %v1018_v44 = vsub.f32 0.0, %v2390_v5 }
 0x16c   :  { %1896 = vlog2.f32 %v1373_v52  ;;  %v1438_v2 = vadd.f32 1.0, %v1891_v54  ;;  %v1441_v60 = vmul.f32 -0.5, %v1891_v54  ;;  %v1377_v9 = vadd.f32 1.0, %v1376_v1 }
 0x16d   :  { %v1444_v53 = vand.u32 2147483647, %v1891_v54  ;;  %vm1380_vm15 = vcmp.lt.f32.partialorder %v1379_v25, 0.0004427343  ;;  %v1019_v43 = vmul.f32 1.442695, %v1017_v42 }
 0x16e   :  { %1898 = vlog2.f32 %v1438_v2  ;;  %v1442_v7 = vadd.f32 1.0, %v1441_v60  ;;  %v1378_v3 = vmul.f32 %v1889_v50, %v1377_v9  ;;  %v1077_v29 = vmul.f32 1.442695, %v1074_v45 }
 0x16f   :  { %v1893_v51 = vpop.eup %1892  ;;  %vm1445_vm0 = vcmp.lt.f32.partialorder %v1444_v53, 0.0004427343  ;;  %1900 = vpow2.f32 %v1075_v24  ;;  %v1130_v30 = vsub.f32 0.0, %v2392_v13  ;;  %v1021_v48 = vmul.f32 1.442695, %v1018_v44 }
 0x170   :  { %v1431_v58 = vmul.f32 0.6931472, %v1893_v51  ;;  %v1443_v17 = vmul.f32 %v1891_v54, %v1442_v7  ;;  %1902 = vpow2.f32 %v1019_v43  ;;  %v1129_v55 = vsub.f32 0.0, %v2394_v6 }
 0x171   :  { %1904 = vpow2.f32 %v1077_v29  ;;  %v1133_v49 = vmul.f32 1.442695, %v1130_v30  ;;  %v1186_v4 = vsub.f32 0.0, %v2396_v33  ;;  %v1185_v50 = vsub.f32 0.0, %v2406_v16 }
 0x172   :  { %v1437_v34 = vsel %vm1436_vm2, %v1434_v61, %v1431_v58  ;;  %1906 = vpow2.f32 %v1021_v48  ;;  %v1131_v37 = vmul.f32 1.442695, %v1129_v55  ;;  %v1242_v57 = vsub.f32 0.0, %v2408_v18 }
 0x173   :  { %v1895_v56 = vpop.eup %1894  ;;  %v1447_v38 = vsel %vm1421_vm4, %v2382_v46, %v1437_v34  ;;  %1908 = vpow2.f32 %v1133_v49  ;;  %v1189_v5 = vmul.f32 1.442695, %v1186_v4  ;;  %v1187_v52 = vmul.f32 1.442695, %v1185_v50 }
 0x174   :  { %v1384_v59 = vmul.f32 0.6931472, %v1895_v56  ;;  %1910 = vpow2.f32 %v1131_v37  ;;  %v1241_v13 = vsub.f32 0.0, %v2410_v22  ;;  %v1245_v2 = vmul.f32 1.442695, %v1242_v57 }
 0x175   :  { %1912 = vpow2.f32 %v1189_v5  ;;  %v1298_v19 = vsub.f32 0.0, %v2412_v23  ;;  %v1297_v18 = vsub.f32 0.0, %v2417_v36  ;;  %v1410_v43 = vsub.f32 0.0, %v2424_v63 }
 0x176   :  { %v1897_v10 = vpop.eup %1896  ;;  %v1390_v15 = vsel %vm1389_vm13, %v1387_v20, %v1384_v59  ;;  %1914 = vpow2.f32 %v1187_v52  ;;  %v1243_v0 = vmul.f32 1.442695, %v1241_v13  ;;  %v1409_v48 = vsub.f32 0.0, %v2382_v46 }
 0x177   :  { %v1375_v26 = vmul.f32 0.6931472, %v1897_v10  ;;  %v1392_v14 = vsel %vm1366_vm12, %v2419_v28, %v1390_v15  ;;  %1916 = vpow2.f32 %v1245_v2  ;;  %v1301_v60 = vmul.f32 1.442695, %v1298_v19 }
 0x178   :  { %v1899_v12 = vpop.eup %1898  ;;  %1397 = vrot.lane.b32.xlu1 %v1392_v14, %s2000_s1  ;;  %v1299_v9 = vmul.f32 1.442695, %v1297_v18  ;;  %v1354_v14 = vsub.f32 0.0, %v2419_v28  ;;  %v1413_v50 = vmul.f32 1.442695, %v1410_v43  ;;  %vm1462_vm5 = vcmask 519168  }
 0x179   :  { %v1381_v62 = vsel %vm1380_vm15, %v1378_v3, %v1375_v26  ;;  %v1440_v21 = vmul.f32 0.6931472, %v1899_v12  ;;  %v1901_v47 = vpop.eup %1900  ;;  %v1411_v13 = vmul.f32 1.442695, %v1409_v48 }
 0x17a   :  { %v1391_v27 = vsel %vm1365_vm14, %v2421_v41, %v1381_v62  ;;  %v1903_v54 = vpop.eup %1902  ;;  %v1079_v6 = vadd.f32 1.0, %v1901_v47  ;;  %v1357_v24 = vmul.f32 1.442695, %v1354_v14 }
 0x17b   :  { %1395 = vrot.lane.b32.xlu0 %v1391_v27, %s2000_s1  ;;  %v1446_v32 = vsel %vm1445_vm0, %v1443_v17, %v1440_v21  ;;  %v1023_v33 = vadd.f32 1.0, %v1903_v54  ;;  %v1905_v1 = vpop.eup %1904  ;;  %v1353_v27 = vsub.f32 0.0, %v2421_v41 }
 0x17c   :  { %v1448_v35 = vsel %vm1422_vm3, %v2424_v63, %v1446_v32  ;;  %v1907_v16 = vpop.eup %1906  ;;  %1918 = vrcp.f32 %v1079_v6  ;;  %v1080_v40 = vadd.f32 1.0, %v1905_v1 }
 0x17d   :  { %1453 = vrot.lane.b32.xlu1 %v1448_v35, %s2000_s1  ;;  %1920 = vrcp.f32 %v1023_v33  ;;  %v1909_v39 = vpop.eup %1908  ;;  %v1024_v51 = vadd.f32 1.0, %v1907_v16  ;;  %v1355_v28 = vmul.f32 1.442695, %v1353_v27 }
 0x17e   :  { %1922 = vpow2.f32 %v1243_v0  ;;  %v1911_v22 = vpop.eup %1910  ;;  %v1136_v23 = vadd.f32 1.0, %v1909_v39 }
 0x17f   :  { %1451 = vrot.lane.b32.xlu0 %v1447_v38, %s2000_s1  ;;  %1924 = vpow2.f32 %v1301_v60  ;;  %v1913_v56 = vpop.eup %1912  ;;  %v1135_v25 = vadd.f32 1.0, %v1911_v22 }
 0x180   :  { %1926 = vrcp.f32 %v1080_v40  ;;  %v1915_v59 = vpop.eup %1914  ;;  %v1192_v36 = vadd.f32 1.0, %v1913_v56 }
 0x181   :  { %1928 = vrcp.f32 %v1024_v51  ;;  %v1917_v20 = vpop.eup %1916  ;;  %v1191_v8 = vadd.f32 1.0, %v1915_v59 }
 0x182   :  { %1930 = vpow2.f32 %v1299_v9  ;;  %v1248_v58 = vadd.f32 1.0, %v1917_v20 }
 0x183   :  { %1932 = vrcp.f32 %v1136_v23 }
 0x184   :  { %1934 = vrcp.f32 %v1135_v25 }
 0x185   :  { %1936 = vrcp.f32 %v1192_v36 }
 0x186   :  { %v1919_v7 = vpop.eup %1918  ;;  %1938 = vrcp.f32 %v1191_v8 }
 0x187   :  { %v1921_v10 = vpop.eup %1920  ;;  %1940 = vrcp.f32 %v1248_v58 }
 0x188   :  { %v1923_v31 = vpop.eup %1922 }
 0x189   :  { %v1925_v12 = vpop.eup %1924  ;;  %v1247_v61 = vadd.f32 1.0, %v1923_v31 }
 0x18a   :  { %v1927_v62 = vpop.eup %1926  ;;  %v1304_v42 = vadd.f32 1.0, %v1925_v12 }
 0x18b   :  { %v1929_v32 = vpop.eup %1928  ;;  %1942 = vrcp.f32 %v1247_v61 }
 0x18c   :  { %v1931_v38 = vpop.eup %1930  ;;  %1944 = vrcp.f32 %v1304_v42 }
 0x18d   :  { %v1933_v45 = vpop.eup %1932  ;;  %v1303_v49 = vadd.f32 1.0, %v1931_v38  ;;  %1946 = vpow2.f32 %v1357_v24 }
 0x18e   :  { %v1935_v30 = vpop.eup %1934  ;;  %1948 = vpow2.f32 %v1355_v28 }
 0x18f   :  { %v1937_v57 = vpop.eup %1936  ;;  %1950 = vrcp.f32 %v1303_v49 }
 0x190   :  { %v1939_v63 = vpop.eup %1938  ;;  %1952 = vpow2.f32 %v1413_v50 }
 0x191   :  { %v1941_v46 = vpop.eup %1940  ;;  %1954 = vpow2.f32 %v1411_v13 }
 0x195   :  { %v1943_v0 = vpop.eup %1942 }
 0x196   :  { %v1945_v40 = vpop.eup %1944 }
 0x197   :  { %v1947_v51 = vpop.eup %1946 }
 0x198   :  { %v1949_v23 = vpop.eup %1948  ;;  %v1360_v36 = vadd.f32 1.0, %v1947_v51 }
 0x199   :  { %v1951_v56 = vpop.eup %1950 }
 0x19a   :  { %1956 = vrcp.f32 %v1360_v36 }
 0x1c7   :  { %v1116_v53 = vpop.permute.xlu1 %1115 }
 0x1c8   :  { %v1121_v15 = vmul.f32 %v1919_v7, %v1116_v53  ;;  %v1060_v26 = vpop.permute.xlu0 %1059  ;;  %v1953_v7 = vpop.eup %1952 }
 0x1c9   :  { %v1065_v3 = vmul.f32 %v1921_v10, %v1060_v26  ;;  %v1359_v10 = vadd.f32 1.0, %v1949_v23  ;;  %v1955_v53 = vpop.eup %1954  ;;  %v1416_v31 = vadd.f32 1.0, %v1953_v7 }
 0x1ca   :  { %v1957_v26 = vpop.eup %1956 }
 0x1cb   :  { %v1123_v21 = vadd.f32 %v1121_v15, %v1065_v3  ;;  %v1118_v17 = vpop.permute.xlu1 %1117  ;;  %1958 = vrcp.f32 %v1359_v10  ;;  %v1415_v15 = vadd.f32 1.0, %v1955_v53 }
 0x1cc   :  { %v1122_v34 = vmul.f32 %v1927_v62, %v1118_v17  ;;  %v1062_v35 = vpop.permute.xlu0 %1061  ;;  %1960 = vrcp.f32 %v1416_v31 }
 0x1cd   :  { %v1066_v11 = vmul.f32 %v1929_v32, %v1062_v35  ;;  %1962 = vrcp.f32 %v1415_v15 }
 0x1cf   :  { %v1124_v44 = vadd.f32 %v1122_v34, %v1066_v11  ;;  %v1174_v29 = vpop.permute.xlu1 %1173 }
 0x1d0   :  { %v1178_v55 = vmul.f32 %v1933_v45, %v1174_v29  ;;  %v1172_v41 = vpop.permute.xlu0 %1171 }
 0x1d1   :  { %v1177_v4 = vmul.f32 %v1935_v30, %v1172_v41 }
 0x1d2   :  { %v1180_v37 = vadd.f32 %v1178_v55, %v1124_v44 }
 0x1d3   :  { %v1179_v5 = vadd.f32 %v1177_v4, %v1123_v21  ;;  %v1230_v47 = vpop.permute.xlu1 %1229 }
 0x1d4   :  { %v1234_v52 = vmul.f32 %v1937_v57, %v1230_v47  ;;  %v1228_v54 = vpop.permute.xlu0 %1227 }
 0x1d5   :  { %v1233_v2 = vmul.f32 %v1939_v63, %v1228_v54  ;;  %v1959_v12 = vpop.eup %1958 }
 0x1d6   :  { %v1236_v6 = vadd.f32 %v1234_v52, %v1180_v37  ;;  %v1961_v17 = vpop.eup %1960 }
 0x1d7   :  { %v1235_v19 = vadd.f32 %v1233_v2, %v1179_v5  ;;  %v1286_v33 = vpop.permute.xlu1 %1285  ;;  %v1963_v34 = vpop.eup %1962 }
 0x1d8   :  { %v1290_v1 = vmul.f32 %v1941_v46, %v1286_v33  ;;  %v1284_v16 = vpop.permute.xlu0 %1283 }
 0x1d9   :  { %v1289_v60 = vmul.f32 %v1943_v0, %v1284_v16  ;;  %v1974_v16 = vld [vmem:[%s2647_s0] sm:$0xff] }
 0x1da   :  { %v1292_v18 = vadd.f32 %v1290_v1, %v1236_v6 }
 0x1db   :  { %v1342_v39 = vpop.permute.xlu1 %1341  ;;  %v1291_v22 = vadd.f32 %v1289_v60, %v1235_v19  ;;  %v1975_v60 = vld [vmem:[%s2647_s0 + $0x8] sm:$0xf]  ;;  %s2001_s0 = smov [#allocation2]  }
 0x1dc   :  { %v1346_v9 = vmul.f32 %v1945_v40, %v1342_v39  ;;  %v1340_v59 = vpop.permute.xlu0 %1339  ;;  %s1528_s6 = sshll.u32 %s2001_s0, 4  ;;  %s1529_s6 = int_to_ptr.vmem [resolvable:$true] %s1528_s6 }
 0x1dd   :  { %v1345_v20 = vmul.f32 %v1951_v56, %v1340_v59  ;;  %s1976_s7 = scalar_lea.vmem %s1529_s6, 256  ;;  %p1981_p1 = scmp.lt.s32.totalorder %s1529_s6, %s1529_s6 }
 0x1de   :  { %v1348_v25 = vadd.f32 %v1346_v9, %v1292_v18  ;;  %p1977_p0 = scmp.ne.s32.totalorder %s1529_s6, %s1976_s7  ;;  %p1982_p2 = scmp.lt.s32.totalorder %s1976_s7, %s1976_s7 }
 0x1df   :  { %v1347_v8 = vadd.f32 %v1345_v20, %v1291_v22 }
 0x1e0   :  { %p1983_p3 = por %p1982_p2, %p1981_p1 }
 0x1e2   :  { %p1984_p4 = pnand %p1983_p3, %p1977_p0 }
 0x1ea   :  { %v1398_v3 = vpop.permute.xlu1 %1397 }
 0x1eb   :  { %v1402_v58 = vmul.f32 %v1957_v26, %v1398_v3 }
 0x1ed   :  { %v1396_v14 = vpop.permute.xlu0 %1395  ;;  %v1404_v62 = vadd.f32 %v1402_v58, %v1348_v25 }
 0x1ee   :  { %v1401_v21 = vmul.f32 %v1959_v12, %v1396_v14 }
 0x1ef   :  { %v1454_v61 = vpop.permute.xlu1 %1453 }
 0x1f0   :  { %v1403_v27 = vadd.f32 %v1401_v21, %v1347_v8  ;;  %v1458_v32 = vmul.f32 %v1961_v17, %v1454_v61 }
 0x1f1   :  { %v1452_v35 = vpop.permute.xlu0 %1451 }
 0x1f2   :  { %v1460_v38 = vadd.f32 %v1458_v32, %v1404_v62  ;;  %v1457_v11 = vmul.f32 %v1963_v34, %v1452_v35 }
 0x1f4   :  { %v1463_v42 = vsel %vm1462_vm5, %v1460_v38, 0.0  ;;  %v1459_v24 = vadd.f32 %v1457_v11, %v1403_v27 }
 0x1f6   :  { %v1461_v43 = vsel %vm31_vm1, %v1459_v24, 0.0 }
 0x1f7   :  { %v1464_v45 = vadd.f32 %v1463_v42, %v1461_v43 }
 0x1f9   :  { %v1465_v44 = vrot.slane %v1464_v45, 4 }
 0x1fb   :  { %v1466_v29 = vadd.f32 %v1465_v44, %v1464_v45 }
 0x1fd   :  { %v1467_v28 = vrot.slane %v1466_v29, 2 }
 0x1ff   :  { %v1468_v30 = vadd.f32 %v1467_v28, %v1466_v29 }
 0x201   :  { %v1469_v48 = vrot.slane %v1468_v30, 1 }
 0x203   :  { %v1470_v55 = vadd.f32 %v1469_v48, %v1468_v30 }
 0x205   :  { %v1472_v41 = vmul.f32 0.083333336, %v1470_v55 }
 0x207   :  { %v1473_v49 = vsub.f32 %v1459_v24, %v1472_v41  ;;  %v1474_v4 = vsub.f32 %v1460_v38, %v1472_v41 }
 0x209   :  { %v1475_v37 = vmul.f32 %v1473_v49, %v1473_v49  ;;  %v1476_v50 = vmul.f32 %v1474_v4, %v1474_v4 }
 0x20b   :  { %v1477_v57 = vsel %vm31_vm1, %v1475_v37, 0.0  ;;  %v1478_v5 = vsel %vm1462_vm5, %v1476_v50, 0.0 }
 0x20c   :  { %v1479_v47 = vadd.f32 %v1478_v5, %v1477_v57 }
 0x20e   :  { %v1480_v63 = vrot.slane %v1479_v47, 4 }
 0x210   :  { %v1481_v52 = vadd.f32 %v1480_v63, %v1479_v47 }
 0x212   :  { %v1482_v54 = vrot.slane %v1481_v52, 2 }
 0x214   :  { %v1483_v13 = vadd.f32 %v1482_v54, %v1481_v52 }
 0x216   :  { %v1484_v2 = vrot.slane %v1483_v13, 1 }
 0x218   :  { %v1485_v6 = vadd.f32 %v1484_v2, %v1483_v13 }
 0x21a   :  { %v1486_v46 = vmul.f32 0.083333336, %v1485_v6 }
 0x21c   :  { %v1487_v19 = vadd.f32 1e-05, %v1486_v46 }
 0x21e   :  { %1964 = vrsqrt.f32 %v1487_v19 }
 0x228   :  { %v1965_v33 = vpop.eup %1964 }
 0x229   :  { %v1489_v1 = vmul.f32 %v1965_v33, %v1473_v49  ;;  %v1490_v0 = vmul.f32 %v1965_v33, %v1474_v4 }
 0x22b   :  { %v1491_v18 = vadd.f32 %v1974_v16, %v1489_v1  ;;  %v1492_v40 = vadd.f32 %v1975_v60, %v1490_v0 }
 0x22d   :  { %v1495_v39 = vmin.f32 %v1491_v18, 20.0  ;;  %v1496_v51 = vmin.f32 %v1492_v40, 20.0  ;;  %vm1493_vm7 = vcmp.gt.f32.partialorder %v1491_v18, 20.0  ;;  %vm1494_vm9 = vcmp.gt.f32.partialorder %v1492_v40, 20.0 }
 0x22f   :  { %v1497_v22 = vmul.f32 1.442695, %v1495_v39  ;;  %v1499_v9 = vmul.f32 1.442695, %v1496_v51 }
 0x231   :  { %1966 = vpow2.f32 %v1497_v22 }
 0x232   :  { %1968 = vpow2.f32 %v1499_v9 }
 0x23b   :  { %v1967_v23 = vpop.eup %1966 }
 0x23c   :  { %v1969_v56 = vpop.eup %1968  ;;  %v1501_v25 = vadd.f32 1.0, %v1967_v23  ;;  %v1504_v20 = vmul.f32 -0.5, %v1967_v23  ;;  %v1507_v8 = vand.u32 2147483647, %v1967_v23 }
 0x23d   :  { %v1510_v59 = vadd.f32 1.0, %v1969_v56  ;;  %v1513_v36 = vmul.f32 -0.5, %v1969_v56  ;;  %v1516_v53 = vand.u32 2147483647, %v1969_v56 }
 0x23e   :  { %1970 = vlog2.f32 %v1501_v25  ;;  %v1505_v7 = vadd.f32 1.0, %v1504_v20  ;;  %vm1508_vm6 = vcmp.lt.f32.partialorder %v1507_v8, 0.0004427343 }
 0x23f   :  { %1972 = vlog2.f32 %v1510_v59  ;;  %v1514_v10 = vadd.f32 1.0, %v1513_v36  ;;  %vm1517_vm8 = vcmp.lt.f32.partialorder %v1516_v53, 0.0004427343 }
 0x240   :  { %v1506_v3 = vmul.f32 %v1967_v23, %v1505_v7 }
 0x241   :  { %v1515_v12 = vmul.f32 %v1969_v56, %v1514_v10 }
 0x248   :  { %v1971_v31 = vpop.eup %1970 }
 0x249   :  { %v1973_v15 = vpop.eup %1972  ;;  %v1503_v26 = vmul.f32 0.6931472, %v1971_v31 }
 0x24a   :  { %v1512_v58 = vmul.f32 0.6931472, %v1973_v15 }
 0x24b   :  { %v1509_v14 = vsel %vm1508_vm6, %v1506_v3, %v1503_v26 }
 0x24c   :  { %v1518_v62 = vsel %vm1517_vm8, %v1515_v12, %v1512_v58  ;;  %v1519_v21 = vsel %vm1493_vm7, %v1491_v18, %v1509_v14 }
 0x24d   :  { %v1520_v17 = vsel %vm1494_vm9, %v1492_v40, %v1518_v62  ;;  %1521 = vst.msk [vmem:[#allocation2] sm:$0xff] %vm31_vm1, %v1519_v21 }
 0x24e   :  { %1522 = vst.msk [vmem:[#allocation2 + $0x8] sm:$0xf] %vm1462_vm5, %v1520_v17 }
 0x24f   :  { %1987 = shalt.err (!%p1984_p4)
}
 0x250   :  { %s1988_s10 = scalar_lea.hbm %s2652_s5, 256 }
 0x251   :  { %p1989_p5 = scmp.ne.s32.totalorder %s2652_s5, %s1988_s10  ;;  %p1992_p6 = scmp.lt.u32.totalorder %s1988_s10, %s2652_s5 }
 0x253   :  { %p1994_p7 = pnand %p1992_p6, %p1989_p5 }
 0x255   :  { %1997 = shalt.err (!%p1994_p7)
}
 0x256   :  { %s2002_s4 = smov 128   ;;  %s2003_s15 = smov 8  }
 0x257   :  { %1534 = dma.vmem_to_hbm [thread:$0]  %s1529_s6, 256, %s2652_s5, [#allocation3], %s2002_s4, %s2002_s4, %s2003_s15  }
 0x258   :  { %1998 = dma.done.wait [#allocation3], 256  }
 0x259   :  { %1999 = vsyncadd [#allocation3], 4294967040 }
 0x25a   :  { %1538 = vsyncpa [#allocation3], 1 }

</bundles_post_ra>
